<compile_context>
chip_gen: v5e
topology: v5e:2x2
jax: 0.10.0
libtpu: 0.0.40
codegen_flags: <defaults>
</compile_context>

<pallas_src>
import jax
import jax.numpy as jnp
from jax.experimental import pallas as pl
from jax.experimental.pallas import tpu as pltpu


# -----------------------------------------------------------------------------
# Kernel 1: Conv_downsample forward (ifpool=False)
#   conv1d(k=7,p=3)+BN(folded)+ReLU + conv1d(k=7,p=3)+BN(folded)+ReLU
# Layout: x is transposed to (in_ch, N, L) so each working slab is (NT, L) with
# the batch tile NT in the sublane dimension (8 rows when N allows -> full vreg
# sublane utilization).  Taps are built with pltpu.roll (XLU) + boundary mask
# instead of lane-misaligned slices; scalar weights/biases come from SMEM.
# -----------------------------------------------------------------------------
def _conv_block_kernel(x_ref, w1_ref, b1_ref, w2_ref, b2_ref, o_ref):
    # x_ref : (in_ch, NT, L)  VMEM
    # w1_ref: (out_ch*in_ch*7,) SMEM ; b1_ref: (out_ch,) SMEM
    # w2_ref: (out_ch*out_ch*7,) SMEM; b2_ref: (out_ch,) SMEM
    # o_ref : (out_ch, NT, L) VMEM
    K = 7
    in_ch, NT, L = x_ref.shape
    out_ch = o_ref.shape[0]

    lane = jax.lax.broadcasted_iota(jnp.int32, (NT, L), 1)

    def tap(row, d):
        # tap[:, j] = row[:, j + d] if 0 <= j + d < L else 0
        # (== the zero-padded conv tap).  Roll runs in the XLU slot.
        if d == 0:
            return row
        r = pltpu.roll(row, shift=(-d) % L, axis=1)
        if d > 0:
            return jnp.where(lane < L - d, r, 0.0)
        return jnp.where(lane >= -d, r, 0.0)

    # ---- conv1 (BN folded in) + ReLU ----
    acc1 = [jnp.zeros((NT, L), jnp.float32) for _ in range(out_ch)]
    for ci in range(in_ch):
        row = x_ref[ci]                              # (NT, L)
        for k in range(K):
            t = tap(row, k - 3)
            for co in range(out_ch):
                acc1[co] = acc1[co] + w1_ref[(co * in_ch + ci) * K + k] * t
    h = [jnp.maximum(acc1[co] + b1_ref[co], 0.0) for co in range(out_ch)]

    # ---- conv2 (BN folded in) + ReLU ----  (no padded scratch buffer)
    acc2 = [jnp.zeros((NT, L), jnp.float32) for _ in range(out_ch)]
    for ci in range(out_ch):
        row = h[ci]
        for k in range(K):
            t = tap(row, k - 3)
            for co in range(out_ch):
                acc2[co] = acc2[co] + w2_ref[(co * out_ch + ci) * K + k] * t
    for co in range(out_ch):
        o_ref[co] = jnp.maximum(acc2[co] + b2_ref[co], 0.0).astype(o_ref.dtype)


def conv_downsample(x, w1, b1, w2, b2):
    """x: (N, in_ch, L) -> (out_ch, N, L).  Weights already BN-folded."""
    N, in_ch, L = x.shape
    out_ch = w1.shape[0]
    # Batch tile: 8 samples per step when possible (fills all 8 sublanes and
    # keeps >=2 grid steps for megacore when N >= 16); otherwise one full block.
    nt = 8 if N % 8 == 0 else N

    x_t = jnp.transpose(x, (1, 0, 2))                 # (in_ch, N, L)
    w1f = w1.reshape(-1)                              # (out_ch*in_ch*7,)
    w2f = w2.reshape(-1)                              # (out_ch*out_ch*7,)

    return pl.pallas_call(
        _conv_block_kernel,
        out_shape=jax.ShapeDtypeStruct((out_ch, N, L), jnp.float32),
        grid_spec=pltpu.PrefetchScalarGridSpec(
            num_scalar_prefetch=0,
            grid=(N // nt,),
            in_specs=[
                pl.BlockSpec((in_ch, nt, L), lambda n: (0, n, 0)),
                pl.BlockSpec(memory_space=pltpu.MemorySpace.SMEM),
                pl.BlockSpec(memory_space=pltpu.MemorySpace.SMEM),
                pl.BlockSpec(memory_space=pltpu.MemorySpace.SMEM),
                pl.BlockSpec(memory_space=pltpu.MemorySpace.SMEM),
            ],
            out_specs=pl.BlockSpec((out_ch, nt, L), lambda n: (0, n, 0)),
        ),
        compiler_params=pltpu.CompilerParams(dimension_semantics=("parallel",)),
    )(x_t, w1f, b1, w2f, b2)


# -----------------------------------------------------------------------------
# Kernel 2: fused dense GCN for both channels
#   out[c] = A_norm @ (X[c] @ W[c][:, tile]) + b[c][tile]
# Grid = (channel, F // tf); the reduction axis is the full F (no k axis, no
# accumulator scratch), feature tiles are wide (lane-dense stores), channel
# axis is "parallel" so v7x megacore can put one channel per TensorCore.
# -----------------------------------------------------------------------------
def _gcn_fused_kernel(x_ref, w_ref, a_ref, b_ref, o_ref):
    # x_ref: (1, Nn, F); w_ref: (1, F, tf); a_ref: (Nn, Nn); b_ref: (1, 1, tf)
    h = jnp.dot(x_ref[0], w_ref[0], preferred_element_type=jnp.float32)  # (Nn, tf)
    o_ref[0] = (
        jnp.dot(a_ref[...], h, preferred_element_type=jnp.float32) + b_ref[0]
    ).astype(o_ref.dtype)


def gcn_fused(x_stacked, w_stacked, b_stacked, a_norm, *, tf=512):
    """x_stacked: (C,N,F), w_stacked: (C,F,F), b_stacked: (C,1,F),
    a_norm: (N,N) -> (C,N,F)."""
    C, Nn, F = x_stacked.shape
    tf = min(tf, F)
    assert F % tf == 0 and F % 128 == 0
    return pl.pallas_call(
        _gcn_fused_kernel,
        out_shape=jax.ShapeDtypeStruct((C, Nn, F), jnp.float32),
        grid_spec=pltpu.PrefetchScalarGridSpec(
            num_scalar_prefetch=0,
            grid=(C, F // tf),
            in_specs=[
                pl.BlockSpec((1, Nn, F), lambda c, j: (c, 0, 0)),
                pl.BlockSpec((1, F, tf), lambda c, j: (c, 0, j)),
                pl.BlockSpec((Nn, Nn), lambda c, j: (0, 0)),
                pl.BlockSpec((1, 1, tf), lambda c, j: (c, 0, j)),
            ],
            out_specs=pl.BlockSpec((1, Nn, tf), lambda c, j: (c, 0, j)),
        ),
        compiler_params=pltpu.CompilerParams(
            dimension_semantics=("parallel", "parallel"),
            vmem_limit_bytes=48 * 1024 * 1024,
        ),
    )(x_stacked, w_stacked, a_norm, b_stacked)


# -----------------------------------------------------------------------------
# Glue: parameters, BN folding, GCN normalization, rolls, full forward.
# -----------------------------------------------------------------------------
def fold_bn(w, b, gamma, beta, mean, var, eps=1e-5):
    scale = gamma / jnp.sqrt(var + eps)
    return w * scale[:, None, None], (b - mean) * scale + beta


def init_params(key, in_ch, out_ch, feature):
    ks = jax.random.split(key, 6)
    p = {}
    p["conv1_w"] = 0.1 * jax.random.normal(ks[0], (out_ch, in_ch, 7), jnp.float32)
    p["conv1_b"] = 0.1 * jax.random.normal(ks[1], (out_ch,), jnp.float32)
    p["conv2_w"] = 0.1 * jax.random.normal(ks[2], (out_ch, out_ch, 7), jnp.float32)
    p["conv2_b"] = 0.1 * jax.random.normal(ks[3], (out_ch,), jnp.float32)
    # BatchNorm1d defaults (eval mode): gamma=1, beta=0, mean=0, var=1
    for i in (1, 2):
        p[f"bn{i}_gamma"] = jnp.ones((out_ch,), jnp.float32)
        p[f"bn{i}_beta"] = jnp.zeros((out_ch,), jnp.float32)
        p[f"bn{i}_mean"] = jnp.zeros((out_ch,), jnp.float32)
        p[f"bn{i}_var"] = jnp.ones((out_ch,), jnp.float32)
    std = 1.0 / jnp.sqrt(jnp.float32(feature))
    p["gcn1_w"] = std * jax.random.normal(ks[4], (feature, feature), jnp.float32)
    p["gcn1_b"] = jnp.zeros((feature,), jnp.float32)
    p["gcn2_w"] = std * jax.random.normal(ks[5], (feature, feature), jnp.float32)
    p["gcn2_b"] = jnp.zeros((feature,), jnp.float32)
    return p


def gcn_norm_dense(edge_index, num_nodes):
    """Dense D^-1/2 (A + I) D^-1/2 matching PyG gcn_norm (add_self_loops=True).
    Note: assumes edge_index carries no pre-existing self loops / duplicates."""
    src, dst = edge_index[0], edge_index[1]
    A = jnp.zeros((num_nodes, num_nodes), jnp.float32)
    A = A.at[dst, src].add(1.0)                    # message flows src -> dst
    A = A + jnp.eye(num_nodes, dtype=jnp.float32)  # self loops
    deg = A.sum(axis=1)
    dinv = jnp.where(deg > 0, 1.0 / jnp.sqrt(deg), 0.0)
    return dinv[:, None] * A * dinv[None, :]


_roll_rows = jax.vmap(lambda v, s: jnp.roll(v, s))  # per-sample dynamic roll


@jax.jit
def gnn_layer_gcn_forward(x, edge_index, dtp, dts, params):
    N = x.shape[0]

    # dtp.view(-1) * 3072 ; int() truncates toward zero (module hard-codes 3072)
    dtp_shift = jnp.trunc(dtp.reshape(-1) * 3072.0).astype(jnp.int32)
    dts_shift = jnp.trunc(dts.reshape(-1) * 3072.0).astype(jnp.int32)

    # ---- Conv_downsample (Pallas kernel, BN folded into conv weights) ----
    w1, b1 = fold_bn(params["conv1_w"], params["conv1_b"],
                     params["bn1_gamma"], params["bn1_beta"],
                     params["bn1_mean"], params["bn1_var"])
    w2, b2 = fold_bn(params["conv2_w"], params["conv2_b"],
                     params["bn2_gamma"], params["bn2_beta"],
                     params["bn2_mean"], params["bn2_var"])
    value_t = conv_downsample(x, w1, b1, w2, b2)          # (out_ch, N, L)

    # ---- per-sample roll (data movement only; plain JAX glue) ----
    ch0 = _roll_rows(value_t[0], dtp_shift)               # (N, L)
    ch1 = _roll_rows(value_t[1], dts_shift)               # (N, L)

    # ---- fused dense GCN on channels 0 & 1 (single Pallas call) ----
    a_norm = gcn_norm_dense(edge_index, N)
    x_stk = jnp.stack([ch0, ch1], axis=0)                               # (2,N,F)
    w_stk = jnp.stack([params["gcn1_w"], params["gcn2_w"]], axis=0)     # (2,F,F)
    b_stk = jnp.stack([params["gcn1_b"], params["gcn2_b"]], axis=0)[:, None, :]
    g = gcn_fused(x_stk, w_stk, b_stk, a_norm)                          # (2,N,F)

    # ---- roll back & reassemble (channels >= 2 would pass through) ----
    out0 = _roll_rows(g[0], -dtp_shift)
    out1 = _roll_rows(g[1], -dts_shift)
    out_t = jnp.stack([out0, out1], axis=0)                             # (2,N,L)
    if value_t.shape[0] > 2:
        out_t = jnp.concatenate([out_t, value_t[2:]], axis=0)
    return jnp.transpose(out_t, (1, 0, 2))                              # (N,C,L)


if __name__ == "__main__":
    # small shapes: 4 graph nodes, 3 input channels, 2 output channels,
    # feature length 256 (stands in for the module's default 3072)
    N, IN_CH, OUT_CH, FEATURE = 4, 3, 2, 256

    key = jax.random.PRNGKey(0)
    kx, kp, ks, kw = jax.random.split(key, 4)

    x = jax.random.normal(kx, (N, IN_CH, FEATURE), jnp.float32)
    dtp = jax.random.uniform(kp, (N, 1), jnp.float32, 0.0, 0.01)
    dts = jax.random.uniform(ks, (N, 1), jnp.float32, 0.0, 0.01)
    # small bidirectional ring graph on 4 nodes
    edge_index = jnp.array(
        [[0, 1, 1, 2, 2, 3, 3, 0],
         [1, 0, 2, 1, 3, 2, 0, 3]], dtype=jnp.int32)

    params = init_params(kw, IN_CH, OUT_CH, FEATURE)

    out = gnn_layer_gcn_forward(x, edge_index, dtp, dts, params)
    jax.block_until_ready(out)
    assert out.shape == (N, OUT_CH, FEATURE)
    print("KERNEL_OK")
</pallas_src>

<mosaic_0001>
module attributes {stable_mosaic.version = 11 : i64} {
  func.func @_conv_block_kernel(%arg0: i32, %arg1: memref<3x4x256xf32, #tpu.memory_space<vmem>>, %arg2: memref<42xf32, #tpu.memory_space<smem>>, %arg3: memref<2xf32, #tpu.memory_space<smem>>, %arg4: memref<28xf32, #tpu.memory_space<smem>>, %arg5: memref<2xf32, #tpu.memory_space<smem>>, %arg6: memref<2x4x256xf32, #tpu.memory_space<vmem>>) attributes {dimension_semantics = [#tpu.dimension_semantics<parallel>], iteration_bounds = array<i64: 1>, scalar_prefetch = 0 : i64, scratch_operands = 0 : i64, tpu.core_type = #tpu.core_type<tc>, window_params = [{transform_indices = @transform_0, window_bounds = array<i64: 3, 4, 256>}, {transform_indices = @transform_1, window_bounds = array<i64: 42>}, {transform_indices = @transform_2, window_bounds = array<i64: 2>}, {transform_indices = @transform_3, window_bounds = array<i64: 28>}, {transform_indices = @transform_4, window_bounds = array<i64: 2>}, {transform_indices = @transform_5, window_bounds = array<i64: 2, 4, 256>}]} {
    %0 = tpu.iota {dimensions = array<i32: 1>} : vector<4x256xi32>
    %cst = arith.constant 0.000000e+00 : f32
    %1 = vector.broadcast %cst : f32 to vector<4x256xf32>
    %cst_0 = arith.constant 0.000000e+00 : f32
    %2 = vector.broadcast %cst_0 : f32 to vector<4x256xf32>
    %c0 = arith.constant 0 : index
    %c0_1 = arith.constant 0 : index
    %c0_2 = arith.constant 0 : index
    %3 = vector.load %arg1[%c0, %c0_1, %c0_2] : memref<3x4x256xf32, #tpu.memory_space<vmem>>, vector<1x4x256xf32>
    %4 = vector.shape_cast %3 : vector<1x4x256xf32> to vector<4x256xf32>
    %c3_i32 = arith.constant 3 : i32
    %5 = tpu.dynamic_rotate %4 by %c3_i32 dim 1 : vector<4x256xf32>, i32 -> vector<4x256xf32>
    %c3_i32_3 = arith.constant 3 : i32
    %6 = vector.broadcast %c3_i32_3 : i32 to vector<4x256xi32>
    %7 = arith.cmpi sge, %0, %6 : vector<4x256xi32>
    %cst_4 = arith.constant 0.000000e+00 : f32
    %8 = vector.broadcast %cst_4 : f32 to vector<4x256xf32>
    %9 = arith.select %7, %5, %8 : vector<4x256xi1>, vector<4x256xf32>
    %c0_5 = arith.constant 0 : index
    %10 = memref.load %arg2[%c0_5] : memref<42xf32, #tpu.memory_space<smem>>
    %11 = vector.broadcast %10 : f32 to vector<4x256xf32>
    %12 = arith.mulf %11, %9 : vector<4x256xf32>
    %13 = arith.addf %1, %12 : vector<4x256xf32>
    %c21 = arith.constant 21 : index
    %14 = memref.load %arg2[%c21] : memref<42xf32, #tpu.memory_space<smem>>
    %15 = vector.broadcast %14 : f32 to vector<4x256xf32>
    %16 = arith.mulf %15, %9 : vector<4x256xf32>
    %17 = arith.addf %2, %16 : vector<4x256xf32>
    %c2_i32 = arith.constant 2 : i32
    %18 = tpu.dynamic_rotate %4 by %c2_i32 dim 1 : vector<4x256xf32>, i32 -> vector<4x256xf32>
    %c2_i32_6 = arith.constant 2 : i32
    %19 = vector.broadcast %c2_i32_6 : i32 to vector<4x256xi32>
    %20 = arith.cmpi sge, %0, %19 : vector<4x256xi32>
    %cst_7 = arith.constant 0.000000e+00 : f32
    %21 = vector.broadcast %cst_7 : f32 to vector<4x256xf32>
    %22 = arith.select %20, %18, %21 : vector<4x256xi1>, vector<4x256xf32>
    %c1 = arith.constant 1 : index
    %23 = memref.load %arg2[%c1] : memref<42xf32, #tpu.memory_space<smem>>
    %24 = vector.broadcast %23 : f32 to vector<4x256xf32>
    %25 = arith.mulf %24, %22 : vector<4x256xf32>
    %26 = arith.addf %13, %25 : vector<4x256xf32>
    %c22 = arith.constant 22 : index
    %27 = memref.load %arg2[%c22] : memref<42xf32, #tpu.memory_space<smem>>
    %28 = vector.broadcast %27 : f32 to vector<4x256xf32>
    %29 = arith.mulf %28, %22 : vector<4x256xf32>
    %30 = arith.addf %17, %29 : vector<4x256xf32>
    %c1_i32 = arith.constant 1 : i32
    %31 = tpu.dynamic_rotate %4 by %c1_i32 dim 1 : vector<4x256xf32>, i32 -> vector<4x256xf32>
    %c1_i32_8 = arith.constant 1 : i32
    %32 = vector.broadcast %c1_i32_8 : i32 to vector<4x256xi32>
    %33 = arith.cmpi sge, %0, %32 : vector<4x256xi32>
    %cst_9 = arith.constant 0.000000e+00 : f32
    %34 = vector.broadcast %cst_9 : f32 to vector<4x256xf32>
    %35 = arith.select %33, %31, %34 : vector<4x256xi1>, vector<4x256xf32>
    %c2 = arith.constant 2 : index
    %36 = memref.load %arg2[%c2] : memref<42xf32, #tpu.memory_space<smem>>
    %37 = vector.broadcast %36 : f32 to vector<4x256xf32>
    %38 = arith.mulf %37, %35 : vector<4x256xf32>
    %39 = arith.addf %26, %38 : vector<4x256xf32>
    %c23 = arith.constant 23 : index
    %40 = memref.load %arg2[%c23] : memref<42xf32, #tpu.memory_space<smem>>
    %41 = vector.broadcast %40 : f32 to vector<4x256xf32>
    %42 = arith.mulf %41, %35 : vector<4x256xf32>
    %43 = arith.addf %30, %42 : vector<4x256xf32>
    %c3 = arith.constant 3 : index
    %44 = memref.load %arg2[%c3] : memref<42xf32, #tpu.memory_space<smem>>
    %45 = vector.broadcast %44 : f32 to vector<4x256xf32>
    %46 = arith.mulf %45, %4 : vector<4x256xf32>
    %47 = arith.addf %39, %46 : vector<4x256xf32>
    %c24 = arith.constant 24 : index
    %48 = memref.load %arg2[%c24] : memref<42xf32, #tpu.memory_space<smem>>
    %49 = vector.broadcast %48 : f32 to vector<4x256xf32>
    %50 = arith.mulf %49, %4 : vector<4x256xf32>
    %51 = arith.addf %43, %50 : vector<4x256xf32>
    %c255_i32 = arith.constant 255 : i32
    %52 = tpu.dynamic_rotate %4 by %c255_i32 dim 1 : vector<4x256xf32>, i32 -> vector<4x256xf32>
    %c255_i32_10 = arith.constant 255 : i32
    %53 = vector.broadcast %c255_i32_10 : i32 to vector<4x256xi32>
    %54 = arith.cmpi slt, %0, %53 : vector<4x256xi32>
    %cst_11 = arith.constant 0.000000e+00 : f32
    %55 = vector.broadcast %cst_11 : f32 to vector<4x256xf32>
    %56 = arith.select %54, %52, %55 : vector<4x256xi1>, vector<4x256xf32>
    %c4 = arith.constant 4 : index
    %57 = memref.load %arg2[%c4] : memref<42xf32, #tpu.memory_space<smem>>
    %58 = vector.broadcast %57 : f32 to vector<4x256xf32>
    %59 = arith.mulf %58, %56 : vector<4x256xf32>
    %60 = arith.addf %47, %59 : vector<4x256xf32>
    %c25 = arith.constant 25 : index
    %61 = memref.load %arg2[%c25] : memref<42xf32, #tpu.memory_space<smem>>
    %62 = vector.broadcast %61 : f32 to vector<4x256xf32>
    %63 = arith.mulf %62, %56 : vector<4x256xf32>
    %64 = arith.addf %51, %63 : vector<4x256xf32>
    %c254_i32 = arith.constant 254 : i32
    %65 = tpu.dynamic_rotate %4 by %c254_i32 dim 1 : vector<4x256xf32>, i32 -> vector<4x256xf32>
    %c254_i32_12 = arith.constant 254 : i32
    %66 = vector.broadcast %c254_i32_12 : i32 to vector<4x256xi32>
    %67 = arith.cmpi slt, %0, %66 : vector<4x256xi32>
    %cst_13 = arith.constant 0.000000e+00 : f32
    %68 = vector.broadcast %cst_13 : f32 to vector<4x256xf32>
    %69 = arith.select %67, %65, %68 : vector<4x256xi1>, vector<4x256xf32>
    %c5 = arith.constant 5 : index
    %70 = memref.load %arg2[%c5] : memref<42xf32, #tpu.memory_space<smem>>
    %71 = vector.broadcast %70 : f32 to vector<4x256xf32>
    %72 = arith.mulf %71, %69 : vector<4x256xf32>
    %73 = arith.addf %60, %72 : vector<4x256xf32>
    %c26 = arith.constant 26 : index
    %74 = memref.load %arg2[%c26] : memref<42xf32, #tpu.memory_space<smem>>
    %75 = vector.broadcast %74 : f32 to vector<4x256xf32>
    %76 = arith.mulf %75, %69 : vector<4x256xf32>
    %77 = arith.addf %64, %76 : vector<4x256xf32>
    %c253_i32 = arith.constant 253 : i32
    %78 = tpu.dynamic_rotate %4 by %c253_i32 dim 1 : vector<4x256xf32>, i32 -> vector<4x256xf32>
    %c253_i32_14 = arith.constant 253 : i32
    %79 = vector.broadcast %c253_i32_14 : i32 to vector<4x256xi32>
    %80 = arith.cmpi slt, %0, %79 : vector<4x256xi32>
    %cst_15 = arith.constant 0.000000e+00 : f32
    %81 = vector.broadcast %cst_15 : f32 to vector<4x256xf32>
    %82 = arith.select %80, %78, %81 : vector<4x256xi1>, vector<4x256xf32>
    %c6 = arith.constant 6 : index
    %83 = memref.load %arg2[%c6] : memref<42xf32, #tpu.memory_space<smem>>
    %84 = vector.broadcast %83 : f32 to vector<4x256xf32>
    %85 = arith.mulf %84, %82 : vector<4x256xf32>
    %86 = arith.addf %73, %85 : vector<4x256xf32>
    %c27 = arith.constant 27 : index
    %87 = memref.load %arg2[%c27] : memref<42xf32, #tpu.memory_space<smem>>
    %88 = vector.broadcast %87 : f32 to vector<4x256xf32>
    %89 = arith.mulf %88, %82 : vector<4x256xf32>
    %90 = arith.addf %77, %89 : vector<4x256xf32>
    %c1_16 = arith.constant 1 : index
    %c0_17 = arith.constant 0 : index
    %c0_18 = arith.constant 0 : index
    %91 = vector.load %arg1[%c1_16, %c0_17, %c0_18] : memref<3x4x256xf32, #tpu.memory_space<vmem>>, vector<1x4x256xf32>
    %92 = vector.shape_cast %91 : vector<1x4x256xf32> to vector<4x256xf32>
    %c3_i32_19 = arith.constant 3 : i32
    %93 = tpu.dynamic_rotate %92 by %c3_i32_19 dim 1 : vector<4x256xf32>, i32 -> vector<4x256xf32>
    %c3_i32_20 = arith.constant 3 : i32
    %94 = vector.broadcast %c3_i32_20 : i32 to vector<4x256xi32>
    %95 = arith.cmpi sge, %0, %94 : vector<4x256xi32>
    %cst_21 = arith.constant 0.000000e+00 : f32
    %96 = vector.broadcast %cst_21 : f32 to vector<4x256xf32>
    %97 = arith.select %95, %93, %96 : vector<4x256xi1>, vector<4x256xf32>
    %c7 = arith.constant 7 : index
    %98 = memref.load %arg2[%c7] : memref<42xf32, #tpu.memory_space<smem>>
    %99 = vector.broadcast %98 : f32 to vector<4x256xf32>
    %100 = arith.mulf %99, %97 : vector<4x256xf32>
    %101 = arith.addf %86, %100 : vector<4x256xf32>
    %c28 = arith.constant 28 : index
    %102 = memref.load %arg2[%c28] : memref<42xf32, #tpu.memory_space<smem>>
    %103 = vector.broadcast %102 : f32 to vector<4x256xf32>
    %104 = arith.mulf %103, %97 : vector<4x256xf32>
    %105 = arith.addf %90, %104 : vector<4x256xf32>
    %c2_i32_22 = arith.constant 2 : i32
    %106 = tpu.dynamic_rotate %92 by %c2_i32_22 dim 1 : vector<4x256xf32>, i32 -> vector<4x256xf32>
    %c2_i32_23 = arith.constant 2 : i32
    %107 = vector.broadcast %c2_i32_23 : i32 to vector<4x256xi32>
    %108 = arith.cmpi sge, %0, %107 : vector<4x256xi32>
    %cst_24 = arith.constant 0.000000e+00 : f32
    %109 = vector.broadcast %cst_24 : f32 to vector<4x256xf32>
    %110 = arith.select %108, %106, %109 : vector<4x256xi1>, vector<4x256xf32>
    %c8 = arith.constant 8 : index
    %111 = memref.load %arg2[%c8] : memref<42xf32, #tpu.memory_space<smem>>
    %112 = vector.broadcast %111 : f32 to vector<4x256xf32>
    %113 = arith.mulf %112, %110 : vector<4x256xf32>
    %114 = arith.addf %101, %113 : vector<4x256xf32>
    %c29 = arith.constant 29 : index
    %115 = memref.load %arg2[%c29] : memref<42xf32, #tpu.memory_space<smem>>
    %116 = vector.broadcast %115 : f32 to vector<4x256xf32>
    %117 = arith.mulf %116, %110 : vector<4x256xf32>
    %118 = arith.addf %105, %117 : vector<4x256xf32>
    %c1_i32_25 = arith.constant 1 : i32
    %119 = tpu.dynamic_rotate %92 by %c1_i32_25 dim 1 : vector<4x256xf32>, i32 -> vector<4x256xf32>
    %c1_i32_26 = arith.constant 1 : i32
    %120 = vector.broadcast %c1_i32_26 : i32 to vector<4x256xi32>
    %121 = arith.cmpi sge, %0, %120 : vector<4x256xi32>
    %cst_27 = arith.constant 0.000000e+00 : f32
    %122 = vector.broadcast %cst_27 : f32 to vector<4x256xf32>
    %123 = arith.select %121, %119, %122 : vector<4x256xi1>, vector<4x256xf32>
    %c9 = arith.constant 9 : index
    %124 = memref.load %arg2[%c9] : memref<42xf32, #tpu.memory_space<smem>>
    %125 = vector.broadcast %124 : f32 to vector<4x256xf32>
    %126 = arith.mulf %125, %123 : vector<4x256xf32>
    %127 = arith.addf %114, %126 : vector<4x256xf32>
    %c30 = arith.constant 30 : index
    %128 = memref.load %arg2[%c30] : memref<42xf32, #tpu.memory_space<smem>>
    %129 = vector.broadcast %128 : f32 to vector<4x256xf32>
    %130 = arith.mulf %129, %123 : vector<4x256xf32>
    %131 = arith.addf %118, %130 : vector<4x256xf32>
    %c10 = arith.constant 10 : index
    %132 = memref.load %arg2[%c10] : memref<42xf32, #tpu.memory_space<smem>>
    %133 = vector.broadcast %132 : f32 to vector<4x256xf32>
    %134 = arith.mulf %133, %92 : vector<4x256xf32>
    %135 = arith.addf %127, %134 : vector<4x256xf32>
    %c31 = arith.constant 31 : index
    %136 = memref.load %arg2[%c31] : memref<42xf32, #tpu.memory_space<smem>>
    %137 = vector.broadcast %136 : f32 to vector<4x256xf32>
    %138 = arith.mulf %137, %92 : vector<4x256xf32>
    %139 = arith.addf %131, %138 : vector<4x256xf32>
    %c255_i32_28 = arith.constant 255 : i32
    %140 = tpu.dynamic_rotate %92 by %c255_i32_28 dim 1 : vector<4x256xf32>, i32 -> vector<4x256xf32>
    %c255_i32_29 = arith.constant 255 : i32
    %141 = vector.broadcast %c255_i32_29 : i32 to vector<4x256xi32>
    %142 = arith.cmpi slt, %0, %141 : vector<4x256xi32>
    %cst_30 = arith.constant 0.000000e+00 : f32
    %143 = vector.broadcast %cst_30 : f32 to vector<4x256xf32>
    %144 = arith.select %142, %140, %143 : vector<4x256xi1>, vector<4x256xf32>
    %c11 = arith.constant 11 : index
    %145 = memref.load %arg2[%c11] : memref<42xf32, #tpu.memory_space<smem>>
    %146 = vector.broadcast %145 : f32 to vector<4x256xf32>
    %147 = arith.mulf %146, %144 : vector<4x256xf32>
    %148 = arith.addf %135, %147 : vector<4x256xf32>
    %c32 = arith.constant 32 : index
    %149 = memref.load %arg2[%c32] : memref<42xf32, #tpu.memory_space<smem>>
    %150 = vector.broadcast %149 : f32 to vector<4x256xf32>
    %151 = arith.mulf %150, %144 : vector<4x256xf32>
    %152 = arith.addf %139, %151 : vector<4x256xf32>
    %c254_i32_31 = arith.constant 254 : i32
    %153 = tpu.dynamic_rotate %92 by %c254_i32_31 dim 1 : vector<4x256xf32>, i32 -> vector<4x256xf32>
    %c254_i32_32 = arith.constant 254 : i32
    %154 = vector.broadcast %c254_i32_32 : i32 to vector<4x256xi32>
    %155 = arith.cmpi slt, %0, %154 : vector<4x256xi32>
    %cst_33 = arith.constant 0.000000e+00 : f32
    %156 = vector.broadcast %cst_33 : f32 to vector<4x256xf32>
    %157 = arith.select %155, %153, %156 : vector<4x256xi1>, vector<4x256xf32>
    %c12 = arith.constant 12 : index
    %158 = memref.load %arg2[%c12] : memref<42xf32, #tpu.memory_space<smem>>
    %159 = vector.broadcast %158 : f32 to vector<4x256xf32>
    %160 = arith.mulf %159, %157 : vector<4x256xf32>
    %161 = arith.addf %148, %160 : vector<4x256xf32>
    %c33 = arith.constant 33 : index
    %162 = memref.load %arg2[%c33] : memref<42xf32, #tpu.memory_space<smem>>
    %163 = vector.broadcast %162 : f32 to vector<4x256xf32>
    %164 = arith.mulf %163, %157 : vector<4x256xf32>
    %165 = arith.addf %152, %164 : vector<4x256xf32>
    %c253_i32_34 = arith.constant 253 : i32
    %166 = tpu.dynamic_rotate %92 by %c253_i32_34 dim 1 : vector<4x256xf32>, i32 -> vector<4x256xf32>
    %c253_i32_35 = arith.constant 253 : i32
    %167 = vector.broadcast %c253_i32_35 : i32 to vector<4x256xi32>
    %168 = arith.cmpi slt, %0, %167 : vector<4x256xi32>
    %cst_36 = arith.constant 0.000000e+00 : f32
    %169 = vector.broadcast %cst_36 : f32 to vector<4x256xf32>
    %170 = arith.select %168, %166, %169 : vector<4x256xi1>, vector<4x256xf32>
    %c13 = arith.constant 13 : index
    %171 = memref.load %arg2[%c13] : memref<42xf32, #tpu.memory_space<smem>>
    %172 = vector.broadcast %171 : f32 to vector<4x256xf32>
    %173 = arith.mulf %172, %170 : vector<4x256xf32>
    %174 = arith.addf %161, %173 : vector<4x256xf32>
    %c34 = arith.constant 34 : index
    %175 = memref.load %arg2[%c34] : memref<42xf32, #tpu.memory_space<smem>>
    %176 = vector.broadcast %175 : f32 to vector<4x256xf32>
    %177 = arith.mulf %176, %170 : vector<4x256xf32>
    %178 = arith.addf %165, %177 : vector<4x256xf32>
    %c2_37 = arith.constant 2 : index
    %c0_38 = arith.constant 0 : index
    %c0_39 = arith.constant 0 : index
    %179 = vector.load %arg1[%c2_37, %c0_38, %c0_39] : memref<3x4x256xf32, #tpu.memory_space<vmem>>, vector<1x4x256xf32>
    %180 = vector.shape_cast %179 : vector<1x4x256xf32> to vector<4x256xf32>
    %c3_i32_40 = arith.constant 3 : i32
    %181 = tpu.dynamic_rotate %180 by %c3_i32_40 dim 1 : vector<4x256xf32>, i32 -> vector<4x256xf32>
    %c3_i32_41 = arith.constant 3 : i32
    %182 = vector.broadcast %c3_i32_41 : i32 to vector<4x256xi32>
    %183 = arith.cmpi sge, %0, %182 : vector<4x256xi32>
    %cst_42 = arith.constant 0.000000e+00 : f32
    %184 = vector.broadcast %cst_42 : f32 to vector<4x256xf32>
    %185 = arith.select %183, %181, %184 : vector<4x256xi1>, vector<4x256xf32>
    %c14 = arith.constant 14 : index
    %186 = memref.load %arg2[%c14] : memref<42xf32, #tpu.memory_space<smem>>
    %187 = vector.broadcast %186 : f32 to vector<4x256xf32>
    %188 = arith.mulf %187, %185 : vector<4x256xf32>
    %189 = arith.addf %174, %188 : vector<4x256xf32>
    %c35 = arith.constant 35 : index
    %190 = memref.load %arg2[%c35] : memref<42xf32, #tpu.memory_space<smem>>
    %191 = vector.broadcast %190 : f32 to vector<4x256xf32>
    %192 = arith.mulf %191, %185 : vector<4x256xf32>
    %193 = arith.addf %178, %192 : vector<4x256xf32>
    %c2_i32_43 = arith.constant 2 : i32
    %194 = tpu.dynamic_rotate %180 by %c2_i32_43 dim 1 : vector<4x256xf32>, i32 -> vector<4x256xf32>
    %c2_i32_44 = arith.constant 2 : i32
    %195 = vector.broadcast %c2_i32_44 : i32 to vector<4x256xi32>
    %196 = arith.cmpi sge, %0, %195 : vector<4x256xi32>
    %cst_45 = arith.constant 0.000000e+00 : f32
    %197 = vector.broadcast %cst_45 : f32 to vector<4x256xf32>
    %198 = arith.select %196, %194, %197 : vector<4x256xi1>, vector<4x256xf32>
    %c15 = arith.constant 15 : index
    %199 = memref.load %arg2[%c15] : memref<42xf32, #tpu.memory_space<smem>>
    %200 = vector.broadcast %199 : f32 to vector<4x256xf32>
    %201 = arith.mulf %200, %198 : vector<4x256xf32>
    %202 = arith.addf %189, %201 : vector<4x256xf32>
    %c36 = arith.constant 36 : index
    %203 = memref.load %arg2[%c36] : memref<42xf32, #tpu.memory_space<smem>>
    %204 = vector.broadcast %203 : f32 to vector<4x256xf32>
    %205 = arith.mulf %204, %198 : vector<4x256xf32>
    %206 = arith.addf %193, %205 : vector<4x256xf32>
    %c1_i32_46 = arith.constant 1 : i32
    %207 = tpu.dynamic_rotate %180 by %c1_i32_46 dim 1 : vector<4x256xf32>, i32 -> vector<4x256xf32>
    %c1_i32_47 = arith.constant 1 : i32
    %208 = vector.broadcast %c1_i32_47 : i32 to vector<4x256xi32>
    %209 = arith.cmpi sge, %0, %208 : vector<4x256xi32>
    %cst_48 = arith.constant 0.000000e+00 : f32
    %210 = vector.broadcast %cst_48 : f32 to vector<4x256xf32>
    %211 = arith.select %209, %207, %210 : vector<4x256xi1>, vector<4x256xf32>
    %c16 = arith.constant 16 : index
    %212 = memref.load %arg2[%c16] : memref<42xf32, #tpu.memory_space<smem>>
    %213 = vector.broadcast %212 : f32 to vector<4x256xf32>
    %214 = arith.mulf %213, %211 : vector<4x256xf32>
    %215 = arith.addf %202, %214 : vector<4x256xf32>
    %c37 = arith.constant 37 : index
    %216 = memref.load %arg2[%c37] : memref<42xf32, #tpu.memory_space<smem>>
    %217 = vector.broadcast %216 : f32 to vector<4x256xf32>
    %218 = arith.mulf %217, %211 : vector<4x256xf32>
    %219 = arith.addf %206, %218 : vector<4x256xf32>
    %c17 = arith.constant 17 : index
    %220 = memref.load %arg2[%c17] : memref<42xf32, #tpu.memory_space<smem>>
    %221 = vector.broadcast %220 : f32 to vector<4x256xf32>
    %222 = arith.mulf %221, %180 : vector<4x256xf32>
    %223 = arith.addf %215, %222 : vector<4x256xf32>
    %c38 = arith.constant 38 : index
    %224 = memref.load %arg2[%c38] : memref<42xf32, #tpu.memory_space<smem>>
    %225 = vector.broadcast %224 : f32 to vector<4x256xf32>
    %226 = arith.mulf %225, %180 : vector<4x256xf32>
    %227 = arith.addf %219, %226 : vector<4x256xf32>
    %c255_i32_49 = arith.constant 255 : i32
    %228 = tpu.dynamic_rotate %180 by %c255_i32_49 dim 1 : vector<4x256xf32>, i32 -> vector<4x256xf32>
    %c255_i32_50 = arith.constant 255 : i32
    %229 = vector.broadcast %c255_i32_50 : i32 to vector<4x256xi32>
    %230 = arith.cmpi slt, %0, %229 : vector<4x256xi32>
    %cst_51 = arith.constant 0.000000e+00 : f32
    %231 = vector.broadcast %cst_51 : f32 to vector<4x256xf32>
    %232 = arith.select %230, %228, %231 : vector<4x256xi1>, vector<4x256xf32>
    %c18 = arith.constant 18 : index
    %233 = memref.load %arg2[%c18] : memref<42xf32, #tpu.memory_space<smem>>
    %234 = vector.broadcast %233 : f32 to vector<4x256xf32>
    %235 = arith.mulf %234, %232 : vector<4x256xf32>
    %236 = arith.addf %223, %235 : vector<4x256xf32>
    %c39 = arith.constant 39 : index
    %237 = memref.load %arg2[%c39] : memref<42xf32, #tpu.memory_space<smem>>
    %238 = vector.broadcast %237 : f32 to vector<4x256xf32>
    %239 = arith.mulf %238, %232 : vector<4x256xf32>
    %240 = arith.addf %227, %239 : vector<4x256xf32>
    %c254_i32_52 = arith.constant 254 : i32
    %241 = tpu.dynamic_rotate %180 by %c254_i32_52 dim 1 : vector<4x256xf32>, i32 -> vector<4x256xf32>
    %c254_i32_53 = arith.constant 254 : i32
    %242 = vector.broadcast %c254_i32_53 : i32 to vector<4x256xi32>
    %243 = arith.cmpi slt, %0, %242 : vector<4x256xi32>
    %cst_54 = arith.constant 0.000000e+00 : f32
    %244 = vector.broadcast %cst_54 : f32 to vector<4x256xf32>
    %245 = arith.select %243, %241, %244 : vector<4x256xi1>, vector<4x256xf32>
    %c19 = arith.constant 19 : index
    %246 = memref.load %arg2[%c19] : memref<42xf32, #tpu.memory_space<smem>>
    %247 = vector.broadcast %246 : f32 to vector<4x256xf32>
    %248 = arith.mulf %247, %245 : vector<4x256xf32>
    %249 = arith.addf %236, %248 : vector<4x256xf32>
    %c40 = arith.constant 40 : index
    %250 = memref.load %arg2[%c40] : memref<42xf32, #tpu.memory_space<smem>>
    %251 = vector.broadcast %250 : f32 to vector<4x256xf32>
    %252 = arith.mulf %251, %245 : vector<4x256xf32>
    %253 = arith.addf %240, %252 : vector<4x256xf32>
    %c253_i32_55 = arith.constant 253 : i32
    %254 = tpu.dynamic_rotate %180 by %c253_i32_55 dim 1 : vector<4x256xf32>, i32 -> vector<4x256xf32>
    %c253_i32_56 = arith.constant 253 : i32
    %255 = vector.broadcast %c253_i32_56 : i32 to vector<4x256xi32>
    %256 = arith.cmpi slt, %0, %255 : vector<4x256xi32>
    %cst_57 = arith.constant 0.000000e+00 : f32
    %257 = vector.broadcast %cst_57 : f32 to vector<4x256xf32>
    %258 = arith.select %256, %254, %257 : vector<4x256xi1>, vector<4x256xf32>
    %c20 = arith.constant 20 : index
    %259 = memref.load %arg2[%c20] : memref<42xf32, #tpu.memory_space<smem>>
    %260 = vector.broadcast %259 : f32 to vector<4x256xf32>
    %261 = arith.mulf %260, %258 : vector<4x256xf32>
    %262 = arith.addf %249, %261 : vector<4x256xf32>
    %c41 = arith.constant 41 : index
    %263 = memref.load %arg2[%c41] : memref<42xf32, #tpu.memory_space<smem>>
    %264 = vector.broadcast %263 : f32 to vector<4x256xf32>
    %265 = arith.mulf %264, %258 : vector<4x256xf32>
    %266 = arith.addf %253, %265 : vector<4x256xf32>
    %c0_58 = arith.constant 0 : index
    %267 = memref.load %arg3[%c0_58] : memref<2xf32, #tpu.memory_space<smem>>
    %268 = vector.broadcast %267 : f32 to vector<4x256xf32>
    %269 = arith.addf %262, %268 : vector<4x256xf32>
    %cst_59 = arith.constant 0.000000e+00 : f32
    %270 = vector.broadcast %cst_59 : f32 to vector<4x256xf32>
    %271 = arith.maximumf %269, %270 : vector<4x256xf32>
    %c1_60 = arith.constant 1 : index
    %272 = memref.load %arg3[%c1_60] : memref<2xf32, #tpu.memory_space<smem>>
    %273 = vector.broadcast %272 : f32 to vector<4x256xf32>
    %274 = arith.addf %266, %273 : vector<4x256xf32>
    %cst_61 = arith.constant 0.000000e+00 : f32
    %275 = vector.broadcast %cst_61 : f32 to vector<4x256xf32>
    %276 = arith.maximumf %274, %275 : vector<4x256xf32>
    %cst_62 = arith.constant 0.000000e+00 : f32
    %277 = vector.broadcast %cst_62 : f32 to vector<4x256xf32>
    %cst_63 = arith.constant 0.000000e+00 : f32
    %278 = vector.broadcast %cst_63 : f32 to vector<4x256xf32>
    %c3_i32_64 = arith.constant 3 : i32
    %279 = tpu.dynamic_rotate %271 by %c3_i32_64 dim 1 : vector<4x256xf32>, i32 -> vector<4x256xf32>
    %c3_i32_65 = arith.constant 3 : i32
    %280 = vector.broadcast %c3_i32_65 : i32 to vector<4x256xi32>
    %281 = arith.cmpi sge, %0, %280 : vector<4x256xi32>
    %cst_66 = arith.constant 0.000000e+00 : f32
    %282 = vector.broadcast %cst_66 : f32 to vector<4x256xf32>
    %283 = arith.select %281, %279, %282 : vector<4x256xi1>, vector<4x256xf32>
    %c0_67 = arith.constant 0 : index
    %284 = memref.load %arg4[%c0_67] : memref<28xf32, #tpu.memory_space<smem>>
    %285 = vector.broadcast %284 : f32 to vector<4x256xf32>
    %286 = arith.mulf %285, %283 : vector<4x256xf32>
    %287 = arith.addf %277, %286 : vector<4x256xf32>
    %c14_68 = arith.constant 14 : index
    %288 = memref.load %arg4[%c14_68] : memref<28xf32, #tpu.memory_space<smem>>
    %289 = vector.broadcast %288 : f32 to vector<4x256xf32>
    %290 = arith.mulf %289, %283 : vector<4x256xf32>
    %291 = arith.addf %278, %290 : vector<4x256xf32>
    %c2_i32_69 = arith.constant 2 : i32
    %292 = tpu.dynamic_rotate %271 by %c2_i32_69 dim 1 : vector<4x256xf32>, i32 -> vector<4x256xf32>
    %c2_i32_70 = arith.constant 2 : i32
    %293 = vector.broadcast %c2_i32_70 : i32 to vector<4x256xi32>
    %294 = arith.cmpi sge, %0, %293 : vector<4x256xi32>
    %cst_71 = arith.constant 0.000000e+00 : f32
    %295 = vector.broadcast %cst_71 : f32 to vector<4x256xf32>
    %296 = arith.select %294, %292, %295 : vector<4x256xi1>, vector<4x256xf32>
    %c1_72 = arith.constant 1 : index
    %297 = memref.load %arg4[%c1_72] : memref<28xf32, #tpu.memory_space<smem>>
    %298 = vector.broadcast %297 : f32 to vector<4x256xf32>
    %299 = arith.mulf %298, %296 : vector<4x256xf32>
    %300 = arith.addf %287, %299 : vector<4x256xf32>
    %c15_73 = arith.constant 15 : index
    %301 = memref.load %arg4[%c15_73] : memref<28xf32, #tpu.memory_space<smem>>
    %302 = vector.broadcast %301 : f32 to vector<4x256xf32>
    %303 = arith.mulf %302, %296 : vector<4x256xf32>
    %304 = arith.addf %291, %303 : vector<4x256xf32>
    %c1_i32_74 = arith.constant 1 : i32
    %305 = tpu.dynamic_rotate %271 by %c1_i32_74 dim 1 : vector<4x256xf32>, i32 -> vector<4x256xf32>
    %c1_i32_75 = arith.constant 1 : i32
    %306 = vector.broadcast %c1_i32_75 : i32 to vector<4x256xi32>
    %307 = arith.cmpi sge, %0, %306 : vector<4x256xi32>
    %cst_76 = arith.constant 0.000000e+00 : f32
    %308 = vector.broadcast %cst_76 : f32 to vector<4x256xf32>
    %309 = arith.select %307, %305, %308 : vector<4x256xi1>, vector<4x256xf32>
    %c2_77 = arith.constant 2 : index
    %310 = memref.load %arg4[%c2_77] : memref<28xf32, #tpu.memory_space<smem>>
    %311 = vector.broadcast %310 : f32 to vector<4x256xf32>
    %312 = arith.mulf %311, %309 : vector<4x256xf32>
    %313 = arith.addf %300, %312 : vector<4x256xf32>
    %c16_78 = arith.constant 16 : index
    %314 = memref.load %arg4[%c16_78] : memref<28xf32, #tpu.memory_space<smem>>
    %315 = vector.broadcast %314 : f32 to vector<4x256xf32>
    %316 = arith.mulf %315, %309 : vector<4x256xf32>
    %317 = arith.addf %304, %316 : vector<4x256xf32>
    %c3_79 = arith.constant 3 : index
    %318 = memref.load %arg4[%c3_79] : memref<28xf32, #tpu.memory_space<smem>>
    %319 = vector.broadcast %318 : f32 to vector<4x256xf32>
    %320 = arith.mulf %319, %271 : vector<4x256xf32>
    %321 = arith.addf %313, %320 : vector<4x256xf32>
    %c17_80 = arith.constant 17 : index
    %322 = memref.load %arg4[%c17_80] : memref<28xf32, #tpu.memory_space<smem>>
    %323 = vector.broadcast %322 : f32 to vector<4x256xf32>
    %324 = arith.mulf %323, %271 : vector<4x256xf32>
    %325 = arith.addf %317, %324 : vector<4x256xf32>
    %c255_i32_81 = arith.constant 255 : i32
    %326 = tpu.dynamic_rotate %271 by %c255_i32_81 dim 1 : vector<4x256xf32>, i32 -> vector<4x256xf32>
    %c255_i32_82 = arith.constant 255 : i32
    %327 = vector.broadcast %c255_i32_82 : i32 to vector<4x256xi32>
    %328 = arith.cmpi slt, %0, %327 : vector<4x256xi32>
    %cst_83 = arith.constant 0.000000e+00 : f32
    %329 = vector.broadcast %cst_83 : f32 to vector<4x256xf32>
    %330 = arith.select %328, %326, %329 : vector<4x256xi1>, vector<4x256xf32>
    %c4_84 = arith.constant 4 : index
    %331 = memref.load %arg4[%c4_84] : memref<28xf32, #tpu.memory_space<smem>>
    %332 = vector.broadcast %331 : f32 to vector<4x256xf32>
    %333 = arith.mulf %332, %330 : vector<4x256xf32>
    %334 = arith.addf %321, %333 : vector<4x256xf32>
    %c18_85 = arith.constant 18 : index
    %335 = memref.load %arg4[%c18_85] : memref<28xf32, #tpu.memory_space<smem>>
    %336 = vector.broadcast %335 : f32 to vector<4x256xf32>
    %337 = arith.mulf %336, %330 : vector<4x256xf32>
    %338 = arith.addf %325, %337 : vector<4x256xf32>
    %c254_i32_86 = arith.constant 254 : i32
    %339 = tpu.dynamic_rotate %271 by %c254_i32_86 dim 1 : vector<4x256xf32>, i32 -> vector<4x256xf32>
    %c254_i32_87 = arith.constant 254 : i32
    %340 = vector.broadcast %c254_i32_87 : i32 to vector<4x256xi32>
    %341 = arith.cmpi slt, %0, %340 : vector<4x256xi32>
    %cst_88 = arith.constant 0.000000e+00 : f32
    %342 = vector.broadcast %cst_88 : f32 to vector<4x256xf32>
    %343 = arith.select %341, %339, %342 : vector<4x256xi1>, vector<4x256xf32>
    %c5_89 = arith.constant 5 : index
    %344 = memref.load %arg4[%c5_89] : memref<28xf32, #tpu.memory_space<smem>>
    %345 = vector.broadcast %344 : f32 to vector<4x256xf32>
    %346 = arith.mulf %345, %343 : vector<4x256xf32>
    %347 = arith.addf %334, %346 : vector<4x256xf32>
    %c19_90 = arith.constant 19 : index
    %348 = memref.load %arg4[%c19_90] : memref<28xf32, #tpu.memory_space<smem>>
    %349 = vector.broadcast %348 : f32 to vector<4x256xf32>
    %350 = arith.mulf %349, %343 : vector<4x256xf32>
    %351 = arith.addf %338, %350 : vector<4x256xf32>
    %c253_i32_91 = arith.constant 253 : i32
    %352 = tpu.dynamic_rotate %271 by %c253_i32_91 dim 1 : vector<4x256xf32>, i32 -> vector<4x256xf32>
    %c253_i32_92 = arith.constant 253 : i32
    %353 = vector.broadcast %c253_i32_92 : i32 to vector<4x256xi32>
    %354 = arith.cmpi slt, %0, %353 : vector<4x256xi32>
    %cst_93 = arith.constant 0.000000e+00 : f32
    %355 = vector.broadcast %cst_93 : f32 to vector<4x256xf32>
    %356 = arith.select %354, %352, %355 : vector<4x256xi1>, vector<4x256xf32>
    %c6_94 = arith.constant 6 : index
    %357 = memref.load %arg4[%c6_94] : memref<28xf32, #tpu.memory_space<smem>>
    %358 = vector.broadcast %357 : f32 to vector<4x256xf32>
    %359 = arith.mulf %358, %356 : vector<4x256xf32>
    %360 = arith.addf %347, %359 : vector<4x256xf32>
    %c20_95 = arith.constant 20 : index
    %361 = memref.load %arg4[%c20_95] : memref<28xf32, #tpu.memory_space<smem>>
    %362 = vector.broadcast %361 : f32 to vector<4x256xf32>
    %363 = arith.mulf %362, %356 : vector<4x256xf32>
    %364 = arith.addf %351, %363 : vector<4x256xf32>
    %c3_i32_96 = arith.constant 3 : i32
    %365 = tpu.dynamic_rotate %276 by %c3_i32_96 dim 1 : vector<4x256xf32>, i32 -> vector<4x256xf32>
    %c3_i32_97 = arith.constant 3 : i32
    %366 = vector.broadcast %c3_i32_97 : i32 to vector<4x256xi32>
    %367 = arith.cmpi sge, %0, %366 : vector<4x256xi32>
    %cst_98 = arith.constant 0.000000e+00 : f32
    %368 = vector.broadcast %cst_98 : f32 to vector<4x256xf32>
    %369 = arith.select %367, %365, %368 : vector<4x256xi1>, vector<4x256xf32>
    %c7_99 = arith.constant 7 : index
    %370 = memref.load %arg4[%c7_99] : memref<28xf32, #tpu.memory_space<smem>>
    %371 = vector.broadcast %370 : f32 to vector<4x256xf32>
    %372 = arith.mulf %371, %369 : vector<4x256xf32>
    %373 = arith.addf %360, %372 : vector<4x256xf32>
    %c21_100 = arith.constant 21 : index
    %374 = memref.load %arg4[%c21_100] : memref<28xf32, #tpu.memory_space<smem>>
    %375 = vector.broadcast %374 : f32 to vector<4x256xf32>
    %376 = arith.mulf %375, %369 : vector<4x256xf32>
    %377 = arith.addf %364, %376 : vector<4x256xf32>
    %c2_i32_101 = arith.constant 2 : i32
    %378 = tpu.dynamic_rotate %276 by %c2_i32_101 dim 1 : vector<4x256xf32>, i32 -> vector<4x256xf32>
    %c2_i32_102 = arith.constant 2 : i32
    %379 = vector.broadcast %c2_i32_102 : i32 to vector<4x256xi32>
    %380 = arith.cmpi sge, %0, %379 : vector<4x256xi32>
    %cst_103 = arith.constant 0.000000e+00 : f32
    %381 = vector.broadcast %cst_103 : f32 to vector<4x256xf32>
    %382 = arith.select %380, %378, %381 : vector<4x256xi1>, vector<4x256xf32>
    %c8_104 = arith.constant 8 : index
    %383 = memref.load %arg4[%c8_104] : memref<28xf32, #tpu.memory_space<smem>>
    %384 = vector.broadcast %383 : f32 to vector<4x256xf32>
    %385 = arith.mulf %384, %382 : vector<4x256xf32>
    %386 = arith.addf %373, %385 : vector<4x256xf32>
    %c22_105 = arith.constant 22 : index
    %387 = memref.load %arg4[%c22_105] : memref<28xf32, #tpu.memory_space<smem>>
    %388 = vector.broadcast %387 : f32 to vector<4x256xf32>
    %389 = arith.mulf %388, %382 : vector<4x256xf32>
    %390 = arith.addf %377, %389 : vector<4x256xf32>
    %c1_i32_106 = arith.constant 1 : i32
    %391 = tpu.dynamic_rotate %276 by %c1_i32_106 dim 1 : vector<4x256xf32>, i32 -> vector<4x256xf32>
    %c1_i32_107 = arith.constant 1 : i32
    %392 = vector.broadcast %c1_i32_107 : i32 to vector<4x256xi32>
    %393 = arith.cmpi sge, %0, %392 : vector<4x256xi32>
    %cst_108 = arith.constant 0.000000e+00 : f32
    %394 = vector.broadcast %cst_108 : f32 to vector<4x256xf32>
    %395 = arith.select %393, %391, %394 : vector<4x256xi1>, vector<4x256xf32>
    %c9_109 = arith.constant 9 : index
    %396 = memref.load %arg4[%c9_109] : memref<28xf32, #tpu.memory_space<smem>>
    %397 = vector.broadcast %396 : f32 to vector<4x256xf32>
    %398 = arith.mulf %397, %395 : vector<4x256xf32>
    %399 = arith.addf %386, %398 : vector<4x256xf32>
    %c23_110 = arith.constant 23 : index
    %400 = memref.load %arg4[%c23_110] : memref<28xf32, #tpu.memory_space<smem>>
    %401 = vector.broadcast %400 : f32 to vector<4x256xf32>
    %402 = arith.mulf %401, %395 : vector<4x256xf32>
    %403 = arith.addf %390, %402 : vector<4x256xf32>
    %c10_111 = arith.constant 10 : index
    %404 = memref.load %arg4[%c10_111] : memref<28xf32, #tpu.memory_space<smem>>
    %405 = vector.broadcast %404 : f32 to vector<4x256xf32>
    %406 = arith.mulf %405, %276 : vector<4x256xf32>
    %407 = arith.addf %399, %406 : vector<4x256xf32>
    %c24_112 = arith.constant 24 : index
    %408 = memref.load %arg4[%c24_112] : memref<28xf32, #tpu.memory_space<smem>>
    %409 = vector.broadcast %408 : f32 to vector<4x256xf32>
    %410 = arith.mulf %409, %276 : vector<4x256xf32>
    %411 = arith.addf %403, %410 : vector<4x256xf32>
    %c255_i32_113 = arith.constant 255 : i32
    %412 = tpu.dynamic_rotate %276 by %c255_i32_113 dim 1 : vector<4x256xf32>, i32 -> vector<4x256xf32>
    %c255_i32_114 = arith.constant 255 : i32
    %413 = vector.broadcast %c255_i32_114 : i32 to vector<4x256xi32>
    %414 = arith.cmpi slt, %0, %413 : vector<4x256xi32>
    %cst_115 = arith.constant 0.000000e+00 : f32
    %415 = vector.broadcast %cst_115 : f32 to vector<4x256xf32>
    %416 = arith.select %414, %412, %415 : vector<4x256xi1>, vector<4x256xf32>
    %c11_116 = arith.constant 11 : index
    %417 = memref.load %arg4[%c11_116] : memref<28xf32, #tpu.memory_space<smem>>
    %418 = vector.broadcast %417 : f32 to vector<4x256xf32>
    %419 = arith.mulf %418, %416 : vector<4x256xf32>
    %420 = arith.addf %407, %419 : vector<4x256xf32>
    %c25_117 = arith.constant 25 : index
    %421 = memref.load %arg4[%c25_117] : memref<28xf32, #tpu.memory_space<smem>>
    %422 = vector.broadcast %421 : f32 to vector<4x256xf32>
    %423 = arith.mulf %422, %416 : vector<4x256xf32>
    %424 = arith.addf %411, %423 : vector<4x256xf32>
    %c254_i32_118 = arith.constant 254 : i32
    %425 = tpu.dynamic_rotate %276 by %c254_i32_118 dim 1 : vector<4x256xf32>, i32 -> vector<4x256xf32>
    %c254_i32_119 = arith.constant 254 : i32
    %426 = vector.broadcast %c254_i32_119 : i32 to vector<4x256xi32>
    %427 = arith.cmpi slt, %0, %426 : vector<4x256xi32>
    %cst_120 = arith.constant 0.000000e+00 : f32
    %428 = vector.broadcast %cst_120 : f32 to vector<4x256xf32>
    %429 = arith.select %427, %425, %428 : vector<4x256xi1>, vector<4x256xf32>
    %c12_121 = arith.constant 12 : index
    %430 = memref.load %arg4[%c12_121] : memref<28xf32, #tpu.memory_space<smem>>
    %431 = vector.broadcast %430 : f32 to vector<4x256xf32>
    %432 = arith.mulf %431, %429 : vector<4x256xf32>
    %433 = arith.addf %420, %432 : vector<4x256xf32>
    %c26_122 = arith.constant 26 : index
    %434 = memref.load %arg4[%c26_122] : memref<28xf32, #tpu.memory_space<smem>>
    %435 = vector.broadcast %434 : f32 to vector<4x256xf32>
    %436 = arith.mulf %435, %429 : vector<4x256xf32>
    %437 = arith.addf %424, %436 : vector<4x256xf32>
    %c253_i32_123 = arith.constant 253 : i32
    %438 = tpu.dynamic_rotate %276 by %c253_i32_123 dim 1 : vector<4x256xf32>, i32 -> vector<4x256xf32>
    %c253_i32_124 = arith.constant 253 : i32
    %439 = vector.broadcast %c253_i32_124 : i32 to vector<4x256xi32>
    %440 = arith.cmpi slt, %0, %439 : vector<4x256xi32>
    %cst_125 = arith.constant 0.000000e+00 : f32
    %441 = vector.broadcast %cst_125 : f32 to vector<4x256xf32>
    %442 = arith.select %440, %438, %441 : vector<4x256xi1>, vector<4x256xf32>
    %c13_126 = arith.constant 13 : index
    %443 = memref.load %arg4[%c13_126] : memref<28xf32, #tpu.memory_space<smem>>
    %444 = vector.broadcast %443 : f32 to vector<4x256xf32>
    %445 = arith.mulf %444, %442 : vector<4x256xf32>
    %446 = arith.addf %433, %445 : vector<4x256xf32>
    %c27_127 = arith.constant 27 : index
    %447 = memref.load %arg4[%c27_127] : memref<28xf32, #tpu.memory_space<smem>>
    %448 = vector.broadcast %447 : f32 to vector<4x256xf32>
    %449 = arith.mulf %448, %442 : vector<4x256xf32>
    %450 = arith.addf %437, %449 : vector<4x256xf32>
    %c0_128 = arith.constant 0 : index
    %451 = memref.load %arg5[%c0_128] : memref<2xf32, #tpu.memory_space<smem>>
    %452 = vector.broadcast %451 : f32 to vector<4x256xf32>
    %453 = arith.addf %446, %452 : vector<4x256xf32>
    %cst_129 = arith.constant 0.000000e+00 : f32
    %454 = vector.broadcast %cst_129 : f32 to vector<4x256xf32>
    %455 = arith.maximumf %453, %454 : vector<4x256xf32>
    %c0_130 = arith.constant 0 : index
    %c0_131 = arith.constant 0 : index
    %c0_132 = arith.constant 0 : index
    %456 = vector.load %arg6[%c0_130, %c0_131, %c0_132] : memref<2x4x256xf32, #tpu.memory_space<vmem>>, vector<1x4x256xf32>
    %457 = vector.shape_cast %456 : vector<1x4x256xf32> to vector<4x256xf32>
    %458 = vector.shape_cast %455 : vector<4x256xf32> to vector<1x4x256xf32>
    tpu.vector_store %arg6[%c0_130, %c0_131, %c0_132], %458 {strides = array<i32>} : memref<2x4x256xf32, #tpu.memory_space<vmem>>, vector<1x4x256xf32>,
    %c1_133 = arith.constant 1 : index
    %459 = memref.load %arg5[%c1_133] : memref<2xf32, #tpu.memory_space<smem>>
    %460 = vector.broadcast %459 : f32 to vector<4x256xf32>
    %461 = arith.addf %450, %460 : vector<4x256xf32>
    %cst_134 = arith.constant 0.000000e+00 : f32
    %462 = vector.broadcast %cst_134 : f32 to vector<4x256xf32>
    %463 = arith.maximumf %461, %462 : vector<4x256xf32>
    %c1_135 = arith.constant 1 : index
    %c0_136 = arith.constant 0 : index
    %c0_137 = arith.constant 0 : index
    %464 = vector.load %arg6[%c1_135, %c0_136, %c0_137] : memref<2x4x256xf32, #tpu.memory_space<vmem>>, vector<1x4x256xf32>
    %465 = vector.shape_cast %464 : vector<1x4x256xf32> to vector<4x256xf32>
    %466 = vector.shape_cast %463 : vector<4x256xf32> to vector<1x4x256xf32>
    tpu.vector_store %arg6[%c1_135, %c0_136, %c0_137], %466 {strides = array<i32>} : memref<2x4x256xf32, #tpu.memory_space<vmem>>, vector<1x4x256xf32>,
    return
  }
  func.func @transform_0(%arg0: i32) -> (i32, i32, i32) {
    %c0_i32 = arith.constant 0 : i32
    %c0_i32_0 = arith.constant 0 : i32
    %c0_i32_1 = arith.constant 0 : i32
    return %c0_i32, %arg0, %c0_i32_0 : i32, i32, i32
  }
  func.func @transform_1(%arg0: i32) -> i32 {
    %c0_i32 = arith.constant 0 : i32
    %c0_i32_0 = arith.constant 0 : i32
    return %c0_i32 : i32
  }
  func.func @transform_2(%arg0: i32) -> i32 {
    %c0_i32 = arith.constant 0 : i32
    %c0_i32_0 = arith.constant 0 : i32
    return %c0_i32 : i32
  }
  func.func @transform_3(%arg0: i32) -> i32 {
    %c0_i32 = arith.constant 0 : i32
    %c0_i32_0 = arith.constant 0 : i32
    return %c0_i32 : i32
  }
  func.func @transform_4(%arg0: i32) -> i32 {
    %c0_i32 = arith.constant 0 : i32
    %c0_i32_0 = arith.constant 0 : i32
    return %c0_i32 : i32
  }
  func.func @transform_5(%arg0: i32) -> (i32, i32, i32) {
    %c0_i32 = arith.constant 0 : i32
    %c0_i32_0 = arith.constant 0 : i32
    %c0_i32_1 = arith.constant 0 : i32
    return %c0_i32, %arg0, %c0_i32_0 : i32, i32, i32
  }
}

module attributes {stable_mosaic.version = 11 : i64} {
  func.func @_gcn_fused_kernel(%arg0: i32, %arg1: i32, %arg2: memref<1x4x256xf32, #tpu.memory_space<vmem>>, %arg3: memref<1x256x256xf32, #tpu.memory_space<vmem>>, %arg4: memref<4x4xf32, #tpu.memory_space<vmem>>, %arg5: memref<1x1x256xf32, #tpu.memory_space<vmem>>, %arg6: memref<1x4x256xf32, #tpu.memory_space<vmem>>) attributes {dimension_semantics = [#tpu.dimension_semantics<parallel>, #tpu.dimension_semantics<parallel>], iteration_bounds = array<i64: 2, 1>, scalar_prefetch = 0 : i64, scratch_operands = 0 : i64, tpu.core_type = #tpu.core_type<tc>, window_params = [{transform_indices = @transform_0, window_bounds = array<i64: 1, 4, 256>}, {transform_indices = @transform_1, window_bounds = array<i64: 1, 256, 256>}, {pipeline_mode = #tpu.pipeline_mode<synchronous>, transform_indices = @transform_2, window_bounds = array<i64: 4, 4>}, {transform_indices = @transform_3, window_bounds = array<i64: 1, 1, 256>}, {transform_indices = @transform_4, window_bounds = array<i64: 1, 4, 256>}]} {
    %c0 = arith.constant 0 : index
    %c0_0 = arith.constant 0 : index
    %c0_1 = arith.constant 0 : index
    %0 = vector.load %arg2[%c0, %c0_0, %c0_1] : memref<1x4x256xf32, #tpu.memory_space<vmem>>, vector<1x4x256xf32>
    %1 = vector.shape_cast %0 : vector<1x4x256xf32> to vector<4x256xf32>
    %c0_2 = arith.constant 0 : index
    %c0_3 = arith.constant 0 : index
    %c0_4 = arith.constant 0 : index
    %2 = vector.load %arg3[%c0_2, %c0_3, %c0_4] : memref<1x256x256xf32, #tpu.memory_space<vmem>>, vector<1x256x256xf32>
    %3 = vector.shape_cast %2 : vector<1x256x256xf32> to vector<256x256xf32>
    %cst = arith.constant dense<0.000000e+00> : vector<4x256xf32>
    %4 = tpu.matmul %1, %3, %cst {dimension_numbers = #tpu.dot_dimension_numbers<[1], [0], [0], [1], [0, 0, 1, 1], [], []>} : vector<4x256xf32>, vector<256x256xf32>, vector<4x256xf32> -> vector<4x256xf32>
    %c0_5 = arith.constant 0 : index
    %c0_6 = arith.constant 0 : index
    %5 = vector.load %arg4[%c0_5, %c0_6] : memref<4x4xf32, #tpu.memory_space<vmem>>, vector<4x4xf32>
    %cst_7 = arith.constant dense<0.000000e+00> : vector<4x256xf32>
    %6 = tpu.matmul %5, %4, %cst_7 {dimension_numbers = #tpu.dot_dimension_numbers<[1], [0], [0], [1], [0, 0, 1, 1], [], []>} : vector<4x4xf32>, vector<4x256xf32>, vector<4x256xf32> -> vector<4x256xf32>
    %c0_8 = arith.constant 0 : index
    %c0_9 = arith.constant 0 : index
    %c0_10 = arith.constant 0 : index
    %7 = vector.load %arg5[%c0_8, %c0_9, %c0_10] : memref<1x1x256xf32, #tpu.memory_space<vmem>>, vector<1x1x256xf32>
    %8 = vector.shape_cast %7 : vector<1x1x256xf32> to vector<1x256xf32>
    %9 = vector.broadcast %8 : vector<1x256xf32> to vector<4x256xf32>
    %10 = arith.addf %6, %9 : vector<4x256xf32>
    %c0_11 = arith.constant 0 : index
    %c0_12 = arith.constant 0 : index
    %c0_13 = arith.constant 0 : index
    %11 = vector.load %arg6[%c0_11, %c0_12, %c0_13] : memref<1x4x256xf32, #tpu.memory_space<vmem>>, vector<1x4x256xf32>
    %12 = vector.shape_cast %11 : vector<1x4x256xf32> to vector<4x256xf32>
    %13 = vector.shape_cast %10 : vector<4x256xf32> to vector<1x4x256xf32>
    tpu.vector_store %arg6[%c0_11, %c0_12, %c0_13], %13 {strides = array<i32>} : memref<1x4x256xf32, #tpu.memory_space<vmem>>, vector<1x4x256xf32>,
    return
  }
  func.func @transform_0(%arg0: i32, %arg1: i32) -> (i32, i32, i32) {
    %c0_i32 = arith.constant 0 : i32
    %c0_i32_0 = arith.constant 0 : i32
    %c0_i32_1 = arith.constant 0 : i32
    return %arg0, %c0_i32, %c0_i32_0 : i32, i32, i32
  }
  func.func @transform_1(%arg0: i32, %arg1: i32) -> (i32, i32, i32) {
    %c0_i32 = arith.constant 0 : i32
    %c0_i32_0 = arith.constant 0 : i32
    return %arg0, %c0_i32, %arg1 : i32, i32, i32
  }
  func.func @transform_2(%arg0: i32, %arg1: i32) -> (i32, i32) {
    %c0_i32 = arith.constant 0 : i32
    %c0_i32_0 = arith.constant 0 : i32
    %c0_i32_1 = arith.constant 0 : i32
    return %c0_i32, %c0_i32_0 : i32, i32
  }
  func.func @transform_3(%arg0: i32, %arg1: i32) -> (i32, i32, i32) {
    %c0_i32 = arith.constant 0 : i32
    %c0_i32_0 = arith.constant 0 : i32
    return %arg0, %c0_i32, %arg1 : i32, i32, i32
  }
  func.func @transform_4(%arg0: i32, %arg1: i32) -> (i32, i32, i32) {
    %c0_i32 = arith.constant 0 : i32
    %c0_i32_0 = arith.constant 0 : i32
    return %arg0, %c0_i32, %arg1 : i32, i32, i32
  }
}

</mosaic_0001>

<bundles_post_ra>
// kernel: gnn_layer_gcn_forward.2
= control target key start
LH: loop header
LB: loop body
LE: loop exit
PB: predicated region body
PF: predicated region fallthrough
CT: control target
= control target key end

     0   :  { %10 = vsyncpa [#allocation3], 0  ;;  %s2050_s0 = inlined_call_operand.vmem [shape: f32[3,4,256], index: 0, kind: input, shape index: {}]   ;;  %s2051_s1 = inlined_call_operand.vmem [shape: f32[42], index: 1, kind: input, shape index: {}]   ;;  %s2052_s2 = inlined_call_operand.vmem [shape: f32[2], index: 2, kind: input, shape index: {}]   ;;  %s2053_s3 = inlined_call_operand.vmem [shape: f32[28], index: 3, kind: input, shape index: {}]   ;;  %s2054_s4 = inlined_call_operand.vmem [shape: f32[2], index: 4, kind: input, shape index: {}]   ;;  %s2055_s5 = inlined_call_operand.vmem [shape: f32[2,4,256], index: 5, kind: output, shape index: {}]  }
   0x1   :  { %11 = vsyncpa [#allocation5], 0  ;;  %s29_s20 = sshll.u32 %s2052_s2, 4  ;;  %s30_s20 = int_to_ptr.vmem [resolvable:$true] %s29_s20 }
   0x2   :  { %12 = vsyncpa [#allocation8], 0  ;;  %s20_s23 = sshll.u32 %s2051_s1, 4  ;;  %s1059_s24 = smov [#allocation4]   ;;  %s21_s23 = int_to_ptr.vmem [resolvable:$true] %s20_s23 }
   0x3   :  { %32 = dma.vmem_to_smem %s30_s20, 16, %s1059_s24, [#allocation5]  }
   0x4   :  { %s1060_s25 = smov [#allocation2]   ;;  %s38_s28 = sshll.u32 %s2053_s3, 4  ;;  %s39_s28 = int_to_ptr.vmem [resolvable:$true] %s38_s28 }
   0x5   :  { %23 = dma.vmem_to_smem %s21_s23, 16, %s1060_s25, [#allocation3]  }
   0x6   :  { %s47_s2 = sshll.u32 %s2054_s4, 4  ;;  %s1061_s6 = smov [#allocation6]   ;;  %s48_s2 = int_to_ptr.vmem [resolvable:$true] %s47_s2 }
   0x7   :  { %41 = dma.vmem_to_smem %s39_s28, 16, %s1061_s6, [#allocation5]  }
   0x8   :  { %s1062_s7 = smov [#allocation7]  }
   0x9   :  { %50 = dma.vmem_to_smem %s48_s2, 16, %s1062_s7, [#allocation8]  }
   0xa   :  { %1053 = dma.done.wait [#allocation3], 16  }
   0xb   :  { %1054 = vsyncadd [#allocation3], 4294967280 }
   0xc   :  { %1055 = dma.done.wait [#allocation5], 32  }
   0xd   :  { %1056 = vsyncadd [#allocation5], 4294967264 }
   0xe   :  { %1057 = dma.done.wait [#allocation8], 16  }
   0xf   :  { %1058 = vsyncadd [#allocation8], 4294967280 }
  0x10   :  { %67 = sfence }
  0x11   :  { %v71_v0 = vld [vmem:[%s2050_s0] sm:$0xff]  ;;  %s1063_s3 = smov 3   ;;  %s927_s4 = sld [smem:[#allocation2 + $0x3]]  ;;  %v935_v19 = vld [vmem:[%s2050_s0 + $0x8] sm:$0xff]  ;;  %v1158_v40 = vld [vmem:[%s2050_s0 + $0x10] sm:$0xff]  ;;  %v68_v54 = vlaneseq  ;;  %vm898_vm12 = vcmask 1043456  }
  0x12   :  { %73 = vst [vmem:[#allocation1] ss:$2 sm:$0xff] %v71_v0  ;;  %s1064_s9 = smov 2   ;;  %s928_s10 = sld [smem:[#allocation2 + $0x18]] }
  0x13   :  { %s1065_s11 = smov 1   ;;  %s1066_s12 = smov 127   ;;  %v1190_v57 = vand.u32 127, %v68_v54 }
  0x14   :  { %s1067_s13 = smov 126   ;;  %s1068_s16 = smov 125  }
  0x15   :  { %s942_s17 = sld [smem:[#allocation2 + $0xa]]  ;;  %vm82_vm0 = vcmp.lt.s32.totalorder %v1190_v57, 3  ;;  %vm110_vm1 = vcmp.lt.s32.totalorder %v1190_v57, 2  ;;  %vm138_vm2 = vcmp.lt.s32.totalorder %v1190_v57, 1  ;;  %vm188_vm3 = vcmp.lt.s32.totalorder %v1190_v57, 127 }
  0x16   :  { %s943_s18 = sld [smem:[#allocation2 + $0x1f]]  ;;  %vm216_vm4 = vcmp.lt.s32.totalorder %v1190_v57, 126  ;;  %vm85_vm7 = vcmp.ge.s32.totalorder %v1190_v57, 3  ;;  %vm113_vm8 = vcmp.ge.s32.totalorder %v1190_v57, 2  ;;  %vm141_vm9 = vcmp.ge.s32.totalorder %v1190_v57, 1 }
  0x17   :  { %v158_v5 = vstv %s927_s4  ;;  %s957_s21 = sld [smem:[#allocation2 + $0x11]]  ;;  %vm244_vm10 = vcmp.lt.s32.totalorder %v1190_v57, 125 }
  0x18   :  { %v159_v6 = vmul.f32 %v158_v5, %v71_v0  ;;  %v169_v9 = vstv %s928_s10  ;;  %s958_s0 = sld [smem:[#allocation2 + $0x26]] }
  0x19   :  { %v74_v1 = vld.sshfl [vmem:[#allocation1] sm:$0xff pattern:$0x75316420]  ;;  %v75_v2 = vld.sshfl [vmem:[#allocation1 + $0x8] sm:$0xff pattern:$0x75316420]  ;;  %v170_v10 = vmul.f32 %v169_v9, %v71_v0 }
  0x1a   :  { %78 = vrot.lane.b32.xlu0 %v74_v1, %s1063_s3  ;;  %101 = vst [vmem:[#allocation1] ss:$2 sm:$0xff] %v71_v0  ;;  %s1172_s22 = sld [smem:[#allocation2]] }
  0x1b   :  { %v342_v26 = vstv %s942_s17  ;;  %s1174_s23 = sld [smem:[#allocation2 + $0x15]] }
  0x1c   :  { %v343_v27 = vmul.f32 %v935_v19, %v342_v26  ;;  %v353_v30 = vstv %s943_s18  ;;  %s1176_s24 = sld [smem:[#allocation2 + $0x1]] }
  0x1d   :  { %v354_v31 = vmul.f32 %v935_v19, %v353_v30  ;;  %v517_v48 = vstv %s957_s21  ;;  %s1184_s25 = sld [smem:[#allocation2 + $0x16]] }
  0x1e   :  { %v518_v49 = vmul.f32 %v1158_v40, %v517_v48  ;;  %v528_v55 = vstv %s958_s0  ;;  %s1188_s26 = sld [smem:[#allocation2 + $0x2]] }
  0x1f   :  { %s1192_s27 = sld [smem:[#allocation2 + $0x17]]  ;;  %v529_v58 = vmul.f32 %v1158_v40, %v528_v55 }
  0x20   :  { %v90_v59 = vstv %s1172_s22  ;;  %s1222_s28 = sld [smem:[#allocation2 + $0x4]] }
  0x21   :  { %v102_v3 = vld.sshfl [vmem:[#allocation1] sm:$0xff pattern:$0x75316420]  ;;  %v103_v4 = vld.sshfl [vmem:[#allocation1 + $0x8] sm:$0xff pattern:$0x75316420]  ;;  %v96_v60 = vstv %s1174_s23 }
  0x22   :  { %106 = vrot.lane.b32.xlu1 %v102_v3, %s1064_s9  ;;  %80 = vrot.lane.b32.xlu0 %v75_v2, %s1063_s3  ;;  %129 = vst [vmem:[#allocation1] ss:$2 sm:$0xff] %v71_v0  ;;  %v118_v2 = vstv %s1176_s24  ;;  %s1232_s29 = sld [smem:[#allocation2 + $0x19]] }
  0x23   :  { %v124_v3 = vstv %s1184_s25  ;;  %s1240_s30 = sld [smem:[#allocation2 + $0x5]] }
  0x24   :  { %s1244_s2 = sld [smem:[#allocation2 + $0x1a]] }
  0x25   :  { %s1337_s6 = sld [smem:[#allocation2 + $0x6]] }
  0x26   :  { %s1350_s7 = sld [smem:[#allocation2 + $0x7]] }
  0x27   :  { %s1362_s1 = sld [smem:[#allocation2 + $0x8]] }
  0x28   :  { %s1370_s8 = sld [smem:[#allocation2 + $0x1b]] }
  0x29   :  { %v130_v7 = vld.sshfl [vmem:[#allocation1] sm:$0xff pattern:$0x75316420]  ;;  %v131_v8 = vld.sshfl [vmem:[#allocation1 + $0x8] sm:$0xff pattern:$0x75316420] }
  0x2a   :  { %108 = vrot.lane.b32.xlu1 %v103_v4, %s1064_s9  ;;  %161 = vst [vmem:[#allocation1] ss:$2 sm:$0xff] %v159_v6  ;;  %134 = vrot.lane.b32.xlu2 %v130_v7, %s1065_s11  ;;  %v146_v6 = vstv %s1188_s26  ;;  %s1375_s4 = sld [smem:[#allocation2 + $0x9]] }
  0x2b   :  { %s1386_s10 = sld [smem:[#allocation2 + $0x1c]] }
  0x2c   :  { %s1402_s14 = sld [smem:[#allocation2 + $0x1d]] }
  0x2d   :  { %s1409_s15 = sld [smem:[#allocation2 + $0xb]] }
  0x2e   :  { %s1416_s17 = sld [smem:[#allocation2 + $0x1e]] }
  0x2f   :  { %s1425_s18 = sld [smem:[#allocation2 + $0xc]] }
  0x30   :  { %s1441_s19 = sld [smem:[#allocation2 + $0xd]] }
  0x31   :  { %v1119_v11 = vld.sshfl [vmem:[#allocation1] sm:$0xff pattern:$0x75316420]  ;;  %v1121_v12 = vld.sshfl [vmem:[#allocation1 + $0x8] sm:$0xff pattern:$0x75316420] }
  0x32   :  { %172 = vst [vmem:[#allocation1] ss:$2 sm:$0xff] %v170_v10  ;;  %136 = vrot.lane.b32.xlu2 %v131_v8, %s1065_s11  ;;  %v152_v10 = vstv %s1192_s27  ;;  %s1448_s20 = sld [smem:[#allocation2 + $0xe]] }
  0x33   :  { %s1456_s21 = sld [smem:[#allocation2 + $0x20]] }
  0x34   :  { %s1469_s0 = sld [smem:[#allocation2 + $0xf]] }
  0x35   :  { %s1473_s22 = sld [smem:[#allocation2 + $0x10]] }
  0x36   :  { %s1485_s23 = sld [smem:[#allocation2 + $0x21]] }
  0x37   :  { %s1507_s24 = sld [smem:[#allocation2 + $0x22]] }
  0x38   :  { %s1524_s25 = sld [smem:[#allocation2 + $0x12]] }
  0x39   :  { %v1124_v13 = vld.sshfl [vmem:[#allocation1] sm:$0xff pattern:$0x75316420]  ;;  %v1126_v14 = vld.sshfl [vmem:[#allocation1 + $0x8] sm:$0xff pattern:$0x75316420] }
  0x3a   :  { %179 = vst [vmem:[#allocation1] ss:$2 sm:$0xff] %v71_v0  ;;  %s1532_s26 = sld [smem:[#allocation2 + $0x23]] }
  0x3b   :  { %s1541_s27 = sld [smem:[#allocation2 + $0x13]] }
  0x41   :  { %v180_v15 = vld.sshfl [vmem:[#allocation1] sm:$0xff pattern:$0x75316420]  ;;  %v181_v16 = vld.sshfl [vmem:[#allocation1 + $0x8] sm:$0xff pattern:$0x75316420] }
  0x42   :  { %184 = vrot.lane.b32.xlu0 %v180_v15, %s1066_s12  ;;  %186 = vrot.lane.b32.xlu1 %v181_v16, %s1066_s12  ;;  %207 = vst [vmem:[#allocation1] ss:$2 sm:$0xff] %v71_v0 }
  0x49   :  { %v209_v17 = vld.sshfl [vmem:[#allocation1 + $0x8] sm:$0xff pattern:$0x75316420]  ;;  %v208_v18 = vld.sshfl [vmem:[#allocation1] sm:$0xff pattern:$0x75316420] }
  0x4a   :  { %214 = vrot.lane.b32.xlu0 %v209_v17, %s1067_s13  ;;  %235 = vst [vmem:[#allocation1] ss:$2 sm:$0xff] %v71_v0  ;;  %212 = vrot.lane.b32.xlu2 %v208_v18, %s1067_s13 }
  0x51   :  { %v236_v20 = vld.sshfl [vmem:[#allocation1] sm:$0xff pattern:$0x75316420]  ;;  %v237_v21 = vld.sshfl [vmem:[#allocation1 + $0x8] sm:$0xff pattern:$0x75316420] }
  0x52   :  { %240 = vrot.lane.b32.xlu1 %v236_v20, %s1068_s16  ;;  %266 = vst [vmem:[#allocation1] ss:$2 sm:$0xff] %v935_v19  ;;  %242 = vrot.lane.b32.xlu2 %v237_v21, %s1068_s16 }
  0x59   :  { %v267_v22 = vld.sshfl [vmem:[#allocation1] sm:$0xff pattern:$0x75316420]  ;;  %v268_v23 = vld.sshfl [vmem:[#allocation1 + $0x8] sm:$0xff pattern:$0x75316420] }
  0x5a   :  { %271 = vrot.lane.b32.xlu0 %v267_v22, %s1063_s3  ;;  %273 = vrot.lane.b32.xlu1 %v268_v23, %s1063_s3  ;;  %291 = vst [vmem:[#allocation1] ss:$2 sm:$0xff] %v935_v19 }
  0x61   :  { %v293_v24 = vld.sshfl [vmem:[#allocation1 + $0x8] sm:$0xff pattern:$0x75316420]  ;;  %v292_v25 = vld.sshfl [vmem:[#allocation1] sm:$0xff pattern:$0x75316420] }
  0x62   :  { %298 = vrot.lane.b32.xlu0 %v293_v24, %s1064_s9  ;;  %316 = vst [vmem:[#allocation1] ss:$2 sm:$0xff] %v935_v19  ;;  %296 = vrot.lane.b32.xlu2 %v292_v25, %s1064_s9  ;;  %v1252_v25 = vadd.s32 128, %v1190_v57 }
  0x64   :  { %vm192_vm5 = vcmp.lt.s32.totalorder %v1252_v25, 255  ;;  %vm220_vm6 = vcmp.lt.s32.totalorder %v1252_v25, 254  ;;  %vm248_vm11 = vcmp.lt.s32.totalorder %v1252_v25, 253 }
  0x69   :  { %v317_v28 = vld.sshfl [vmem:[#allocation1] sm:$0xff pattern:$0x75316420]  ;;  %v318_v29 = vld.sshfl [vmem:[#allocation1 + $0x8] sm:$0xff pattern:$0x75316420] }
  0x6a   :  { %321 = vrot.lane.b32.xlu1 %v317_v28, %s1065_s11  ;;  %345 = vst [vmem:[#allocation1] ss:$2 sm:$0xff] %v343_v27  ;;  %323 = vrot.lane.b32.xlu2 %v318_v29, %s1065_s11  ;;  %v196_v27 = vstv %s1222_s28  ;;  %v202_v28 = vstv %s1232_s29  ;;  %s1554_s28 = sld [smem:[#allocation2 + $0x24]] }
  0x6b   :  { %s1559_s29 = sld [smem:[#allocation2 + $0x25]] }
  0x71   :  { %v1143_v32 = vld.sshfl [vmem:[#allocation1] sm:$0xff pattern:$0x75316420]  ;;  %v1145_v33 = vld.sshfl [vmem:[#allocation1 + $0x8] sm:$0xff pattern:$0x75316420] }
  0x72   :  { %356 = vst [vmem:[#allocation1] ss:$2 sm:$0xff] %v354_v31 }
  0x79   :  { %v1147_v34 = vld.sshfl [vmem:[#allocation1] sm:$0xff pattern:$0x75316420]  ;;  %v1149_v35 = vld.sshfl [vmem:[#allocation1 + $0x8] sm:$0xff pattern:$0x75316420] }
  0x7a   :  { %363 = vst [vmem:[#allocation1] ss:$2 sm:$0xff] %v935_v19 }
  0x81   :  { %v364_v36 = vld.sshfl [vmem:[#allocation1] sm:$0xff pattern:$0x75316420]  ;;  %v365_v37 = vld.sshfl [vmem:[#allocation1 + $0x8] sm:$0xff pattern:$0x75316420] }
  0x82   :  { %368 = vrot.lane.b32.xlu0 %v364_v36, %s1066_s12  ;;  %370 = vrot.lane.b32.xlu1 %v365_v37, %s1066_s12  ;;  %388 = vst [vmem:[#allocation1] ss:$2 sm:$0xff] %v935_v19 }
  0x84   :  { %v1182_v53 = vpop.permute.xlu2 %134 }
  0x89   :  { %v390_v38 = vld.sshfl [vmem:[#allocation1 + $0x8] sm:$0xff pattern:$0x75316420]  ;;  %v389_v39 = vld.sshfl [vmem:[#allocation1] sm:$0xff pattern:$0x75316420] }
  0x8a   :  { %395 = vrot.lane.b32.xlu0 %v390_v38, %s1067_s13  ;;  %413 = vst [vmem:[#allocation1] ss:$2 sm:$0xff] %v935_v19  ;;  %393 = vrot.lane.b32.xlu2 %v389_v39, %s1067_s13  ;;  %v224_v39 = vstv %s1240_s30  ;;  %s1570_s30 = sld [smem:[#allocation2 + $0x14]] }
  0x8c   :  { %v1169_v47 = vpop.permute.xlu0 %78  ;;  %v1220_v7 = vpop.permute.xlu2 %136 }
  0x8d   :  { %v139_v16 = vsel %vm138_vm2, %v1182_v53, %v1220_v7 }
  0x8e   :  { %v148_v19 = vmul.f32 %v146_v6, %v139_v16  ;;  %v154_v20 = vmul.f32 %v152_v10, %v139_v16 }
  0x91   :  { %v414_v41 = vld.sshfl [vmem:[#allocation1] sm:$0xff pattern:$0x75316420]  ;;  %v415_v42 = vld.sshfl [vmem:[#allocation1 + $0x8] sm:$0xff pattern:$0x75316420] }
  0x92   :  { %418 = vrot.lane.b32.xlu1 %v414_v41, %s1068_s16  ;;  %441 = vst [vmem:[#allocation1] ss:$2 sm:$0xff] %v1158_v40  ;;  %420 = vrot.lane.b32.xlu2 %v415_v42, %s1068_s16 }
  0x94   :  { %v1180_v52 = vpop.permute.xlu1 %106  ;;  %v1186_v56 = vpop.permute.xlu0 %80 }
  0x95   :  { %v83_v61 = vsel %vm82_vm0, %v1169_v47, %v1186_v56 }
  0x96   :  { %v92_v0 = vmul.f32 %v90_v59, %v83_v61  ;;  %v98_v1 = vmul.f32 %v96_v60, %v83_v61 }
  0x99   :  { %v443_v43 = vld.sshfl [vmem:[#allocation1 + $0x8] sm:$0xff pattern:$0x75316420]  ;;  %v442_v44 = vld.sshfl [vmem:[#allocation1] sm:$0xff pattern:$0x75316420] }
  0x9a   :  { %448 = vrot.lane.b32.xlu1 %v443_v43, %s1063_s3  ;;  %446 = vrot.lane.b32.xlu0 %v442_v44, %s1063_s3  ;;  %466 = vst [vmem:[#allocation1] ss:$2 sm:$0xff] %v1158_v40  ;;  %v230_v43 = vstv %s1244_s2  ;;  %s1600_s2 = sld [smem:[#allocation4]] }
  0x9c   :  { %v1212_v4 = vpop.permute.xlu1 %108 }
  0x9d   :  { %v111_v5 = vsel %vm110_vm1, %v1180_v52, %v1212_v4 }
  0x9e   :  { %v120_v8 = vmul.f32 %v118_v2, %v111_v5  ;;  %v126_v9 = vmul.f32 %v124_v3, %v111_v5 }
  0xa0   :  { %v122_v17 = vadd.f32 %v120_v8, %v92_v0  ;;  %v128_v18 = vadd.f32 %v126_v9, %v98_v1  ;;  %v112_v9 = vsel %vm110_vm1, %v1212_v4, %v1180_v52 }
  0xa1   :  { %v468_v45 = vld.sshfl [vmem:[#allocation1 + $0x8] sm:$0xff pattern:$0x75316420]  ;;  %v467_v46 = vld.sshfl [vmem:[#allocation1] sm:$0xff pattern:$0x75316420] }
  0xa2   :  { %473 = vrot.lane.b32.xlu0 %v468_v45, %s1064_s9  ;;  %491 = vst [vmem:[#allocation1] ss:$2 sm:$0xff] %v1158_v40  ;;  %471 = vrot.lane.b32.xlu2 %v467_v46, %s1064_s9  ;;  %v150_v21 = vadd.f32 %v148_v19, %v122_v17  ;;  %v156_v24 = vadd.f32 %v154_v20, %v128_v18  ;;  %v115_v18 = vsel %vm113_vm8, %v112_v9, 0.0 }
  0xa3   :  { %v119_v4 = vmul.f32 %v118_v2, %v115_v18 }
  0xa4   :  { %v167_v30 = vadd.f32 %v1121_v12, %v150_v21  ;;  %v178_v31 = vadd.f32 %v1126_v14, %v156_v24  ;;  %v213_v36 = vpop.permute.xlu2 %212 }
  0xa9   :  { %v492_v50 = vld.sshfl [vmem:[#allocation1] sm:$0xff pattern:$0x75316420]  ;;  %v493_v51 = vld.sshfl [vmem:[#allocation1 + $0x8] sm:$0xff pattern:$0x75316420] }
  0xaa   :  { %496 = vrot.lane.b32.xlu1 %v492_v50, %s1065_s11  ;;  %498 = vrot.lane.b32.xlu2 %v493_v51, %s1065_s11  ;;  %520 = vst [vmem:[#allocation1] ss:$2 sm:$0xff] %v518_v49 }
  0xac   :  { %v1291_v1 = vpop.permute.xlu2 %242 }
  0xb1   :  { %v1202_v62 = vld.sshfl [vmem:[#allocation1] sm:$0xff pattern:$0x75316420]  ;;  %v1204_v63 = vld.sshfl [vmem:[#allocation1 + $0x8] sm:$0xff pattern:$0x75316420] }
  0xb2   :  { %531 = vst [vmem:[#allocation1] ss:$2 sm:$0xff] %v529_v58 }
  0xb4   :  { %v1230_v15 = vpop.permute.xlu0 %184  ;;  %v187_v26 = vpop.permute.xlu1 %186 }
  0xb5   :  { %v190_v29 = vsel %vm188_vm3, %v187_v26, %v1230_v15 }
  0xb6   :  { %v194_v38 = vsel %vm192_vm5, %v190_v29, 0.0 }
  0xb7   :  { %v198_v42 = vmul.f32 %v196_v27, %v194_v38  ;;  %v204_v12 = vmul.f32 %v202_v28, %v194_v38 }
  0xb9   :  { %v1246_v22 = vld.sshfl [vmem:[#allocation1] sm:$0xff pattern:$0x75316420]  ;;  %v1248_v23 = vld.sshfl [vmem:[#allocation1 + $0x8] sm:$0xff pattern:$0x75316420]  ;;  %v200_v46 = vadd.f32 %v198_v42, %v167_v30  ;;  %v206_v48 = vadd.f32 %v204_v12, %v178_v31 }
  0xba   :  { %538 = vst [vmem:[#allocation1] ss:$2 sm:$0xff] %v1158_v40 }
  0xbc   :  { %v215_v37 = vpop.permute.xlu0 %214  ;;  %v1307_v16 = vpop.permute.xlu2 %296 }
  0xbd   :  { %v218_v41 = vsel %vm216_vm4, %v215_v37, %v213_v36 }
  0xbe   :  { %v222_v14 = vsel %vm220_vm6, %v218_v41, 0.0  ;;  %v217_v41 = vsel %vm216_vm4, %v213_v36, %v215_v37 }
  0xbf   :  { %v226_v49 = vmul.f32 %v224_v39, %v222_v14  ;;  %v232_v50 = vmul.f32 %v230_v43, %v222_v14  ;;  %v225_v12 = vmul.f32 %v224_v39, %v217_v41  ;;  %v280_v14 = vstv %s1350_s7  ;;  %s1630_s7 = sld [smem:[#allocation2 + $0x28]] }
  0xc1   :  { %v540_v44 = vld.sshfl [vmem:[#allocation1 + $0x8] sm:$0xff pattern:$0x75316420]  ;;  %v539_v45 = vld.sshfl [vmem:[#allocation1] sm:$0xff pattern:$0x75316420]  ;;  %v1282_v51 = vadd.f32 %v226_v49, %v200_v46  ;;  %v1284_v54 = vadd.f32 %v232_v50, %v206_v48 }
  0xc2   :  { %545 = vrot.lane.b32.xlu1 %v540_v44, %s1066_s12  ;;  %543 = vrot.lane.b32.xlu0 %v539_v45, %s1066_s12  ;;  %563 = vst [vmem:[#allocation1] ss:$2 sm:$0xff] %v1158_v40 }
  0xc4   :  { %v1293_v5 = vpop.permute.xlu1 %240  ;;  %v1330_v29 = vpop.permute.xlu2 %323 }
  0xc9   :  { %v565_v55 = vld.sshfl [vmem:[#allocation1 + $0x8] sm:$0xff pattern:$0x75316420]  ;;  %v564_v58 = vld.sshfl [vmem:[#allocation1] sm:$0xff pattern:$0x75316420] }
  0xca   :  { %570 = vrot.lane.b32.xlu0 %v565_v55, %s1067_s13  ;;  %588 = vst [vmem:[#allocation1] ss:$2 sm:$0xff] %v1158_v40  ;;  %568 = vrot.lane.b32.xlu2 %v564_v58, %s1067_s13  ;;  %v84_v40 = vsel %vm82_vm0, %v1186_v56, %v1169_v47  ;;  %v140_v56 = vsel %vm138_vm2, %v1220_v7, %v1182_v53  ;;  %v305_v58 = vstv %s1362_s1  ;;  %s1648_s1 = sld [smem:[#allocation2 + $0x29]] }
  0xcb   :  { %v87_v17 = vsel %vm85_vm7, %v84_v40, 0.0  ;;  %v143_v19 = vsel %vm141_vm9, %v140_v56, 0.0  ;;  %v125_v7 = vmul.f32 %v124_v3, %v115_v18  ;;  %v245_v3 = vsel %vm244_vm10, %v1293_v5, %v1291_v1 }
  0xcc   :  { %v1295_v8 = vpop.permute.xlu0 %271  ;;  %v1313_v47 = vpop.permute.xlu1 %273  ;;  %v91_v52 = vmul.f32 %v90_v59, %v87_v17  ;;  %v147_v24 = vmul.f32 %v146_v6, %v143_v19  ;;  %v189_v59 = vsel %vm188_vm3, %v1230_v15, %v187_v26  ;;  %v97_v2 = vmul.f32 %v96_v60, %v87_v17 }
  0xcd   :  { %v197_v6 = vmul.f32 %v196_v27, %v189_v59  ;;  %v153_v26 = vmul.f32 %v152_v10, %v143_v19  ;;  %v276_v10 = vsel %vm82_vm0, %v1313_v47, %v1295_v8  ;;  %v203_v49 = vmul.f32 %v202_v28, %v189_v59 }
  0xce   :  { %v121_v21 = vadd.f32 %v119_v4, %v91_v52  ;;  %v127_v15 = vadd.f32 %v125_v7, %v97_v2  ;;  %v277_v44 = vsel %vm85_vm7, %v276_v10, 0.0  ;;  %v231_v28 = vmul.f32 %v230_v43, %v217_v41 }
  0xcf   :  { %v281_v55 = vmul.f32 %v280_v14, %v277_v44  ;;  %v258_v17 = vstv %s1370_s8  ;;  %v330_v52 = vstv %s1375_s4  ;;  %v246_v2 = vsel %vm244_vm10, %v1291_v1, %v1293_v5  ;;  %s1686_s8 = sld [smem:[#allocation4 + $0x1]] }
  0xd0   :  { %v149_v53 = vadd.f32 %v147_v24, %v121_v21  ;;  %v155_v36 = vadd.f32 %v153_v26, %v127_v15  ;;  %v259_v21 = vmul.f32 %v258_v17, %v245_v3  ;;  %v286_v24 = vstv %s1386_s10  ;;  %s1801_s4 = sld [smem:[#allocation6 + $0x6]] }
  0xd1   :  { %v589_v61 = vld.sshfl [vmem:[#allocation1] sm:$0xff pattern:$0x75316420]  ;;  %v590_v0 = vld.sshfl [vmem:[#allocation1 + $0x8] sm:$0xff pattern:$0x75316420]  ;;  %v311_v15 = vstv %s1402_s14 }
  0xd2   :  { %593 = vrot.lane.b32.xlu1 %v589_v61, %s1068_s16  ;;  %595 = vrot.lane.b32.xlu2 %v590_v0, %s1068_s16  ;;  %v166_v31 = vadd.f32 %v1119_v11, %v149_v53  ;;  %v252_v11 = vstv %s1337_s6  ;;  %v177_v48 = vadd.f32 %v1124_v13, %v155_v36  ;;  %v1433_v41 = vsel %vm248_vm11, %v246_v2, 0.0  ;;  %s1615_s6 = sld [smem:[#allocation2 + $0x27]] }
  0xd3   :  { %v253_v39 = vmul.f32 %v252_v11, %v245_v3  ;;  %v1454_v36 = vsel %vm82_vm0, %v1295_v8, %v1313_v47  ;;  %s1803_s10 = sld [smem:[#allocation6 + $0x14]] }
  0xd4   :  { %v1326_v20 = vpop.permute.xlu0 %298  ;;  %v199_v42 = vadd.f32 %v197_v6, %v166_v31  ;;  %v205_v13 = vadd.f32 %v203_v49, %v177_v48  ;;  %v287_v6 = vmul.f32 %v286_v24, %v277_v44  ;;  %v336_v44 = vstv %s1416_s17  ;;  %s1805_s14 = sld [smem:[#allocation6 + $0x9]] }
  0xd5   :  { %v301_v45 = vsel %vm110_vm1, %v1326_v20, %v1307_v16  ;;  %v282_v47 = vmul.f32 %v280_v14, %v1454_v36  ;;  %s1809_s17 = sld [smem:[#allocation6]] }
  0xd6   :  { %v227_v37 = vadd.f32 %v225_v12, %v199_v42  ;;  %v302_v61 = vsel %vm113_vm8, %v301_v45, 0.0  ;;  %v233_v43 = vadd.f32 %v231_v28, %v205_v13  ;;  %v377_v42 = vstv %s1409_s15  ;;  %s1807_s15 = sld [smem:[#allocation6 + $0x17]] }
  0xd7   :  { %v306_v56 = vmul.f32 %v305_v58, %v302_v61  ;;  %v254_v12 = vmul.f32 %v252_v11, %v1433_v41  ;;  %v312_v10 = vmul.f32 %v311_v15, %v302_v61  ;;  %v402_v45 = vstv %s1425_s18  ;;  %s1813_s18 = sld [smem:[#allocation6 + $0xe]] }
  0xd8   :  { %v255_v50 = vadd.f32 %v253_v39, %v227_v37  ;;  %v261_v31 = vadd.f32 %v259_v21, %v233_v43  ;;  %v1498_v28 = vsel %vm110_vm1, %v1307_v16, %v1326_v20 }
  0xd9   :  { %v256_v8 = vadd.f32 %v254_v12, %v1282_v51  ;;  %v427_v51 = vstv %s1441_s19  ;;  %v307_v2 = vmul.f32 %v305_v58, %v1498_v28  ;;  %s1817_s19 = sld [smem:[#allocation6 + $0x1]] }
  0xda   :  { %v283_v18 = vadd.f32 %v281_v55, %v255_v50  ;;  %v289_v3 = vadd.f32 %v287_v6, %v261_v31  ;;  %v383_v31 = vstv %s1456_s21  ;;  %v480_v6 = vstv %s1469_s0  ;;  %s1821_s21 = sld [smem:[#allocation6 + $0x4]] }
  0xdb   :  { %s1824_s0 = sld [smem:[#allocation6 + $0x12]] }
  0xdc   :  { %v1332_v30 = vpop.permute.xlu1 %321  ;;  %v308_v53 = vadd.f32 %v306_v56, %v283_v18  ;;  %v284_v56 = vadd.f32 %v282_v47, %v256_v8 }
  0xdd   :  { %v326_v0 = vsel %vm138_vm2, %v1330_v29, %v1332_v30  ;;  %v1530_v12 = vsel %vm138_vm2, %v1332_v30, %v1330_v29 }
  0xde   :  { %v327_v4 = vsel %vm141_vm9, %v326_v0, 0.0  ;;  %v309_v47 = vadd.f32 %v307_v2, %v284_v56 }
  0xdf   :  { %v331_v59 = vmul.f32 %v330_v52, %v327_v4  ;;  %v337_v49 = vmul.f32 %v336_v44, %v327_v4  ;;  %v455_v4 = vstv %s1448_s20  ;;  %s1819_s20 = sld [smem:[#allocation6 + $0xf]] }
  0xe1   :  { %v333_v26 = vadd.f32 %v331_v59, %v308_v53 }
  0xe3   :  { %v350_v37 = vadd.f32 %v1143_v32, %v333_v26  ;;  %v314_v32 = vadd.f32 %v312_v10, %v289_v3  ;;  %v505_v3 = vstv %s1473_s22  ;;  %s1827_s22 = sld [smem:[#allocation6 + $0x5]] }
  0xe4   :  { %v1355_v60 = vpop.permute.xlu2 %393 }
  0xe5   :  { %v339_v21 = vadd.f32 %v337_v49, %v314_v32  ;;  %v332_v32 = vmul.f32 %v330_v52, %v1530_v12  ;;  %v408_v49 = vstv %s1485_s23  ;;  %s1830_s23 = sld [smem:[#allocation6 + $0x13]] }
  0xe7   :  { %v334_v56 = vadd.f32 %v332_v32, %v309_v47 }
  0xec   :  { %v1395_v40 = vpop.permute.xlu2 %420 }
  0xf4   :  { %v1346_v38 = vpop.permute.xlu0 %368  ;;  %v1364_v27 = vpop.permute.xlu1 %370 }
  0xf5   :  { %v372_v1 = vsel %vm188_vm3, %v1346_v38, %v1364_v27  ;;  %v373_v52 = vsel %vm188_vm3, %v1364_v27, %v1346_v38 }
  0xf6   :  { %v378_v39 = vmul.f32 %v377_v42, %v372_v1 }
  0xf8   :  { %v380_v50 = vadd.f32 %v378_v39, %v350_v37  ;;  %v361_v37 = vadd.f32 %v1147_v34, %v339_v21  ;;  %v384_v39 = vmul.f32 %v383_v31, %v372_v1  ;;  %v260_v34 = vmul.f32 %v258_v17, %v1433_v41 }
  0xf9   :  { %v433_v21 = vstv %s1507_s24  ;;  %s1841_s24 = sld [smem:[#allocation6 + $0x7]] }
  0xfa   :  { %v262_v27 = vadd.f32 %v260_v34, %v1284_v54 }
  0xfc   :  { %v1381_v46 = vpop.permute.xlu0 %395  ;;  %v1427_v7 = vpop.permute.xlu2 %471 }
  0xfd   :  { %v397_v48 = vsel %vm216_vm4, %v1355_v60, %v1381_v46  ;;  %v398_v2 = vsel %vm216_vm4, %v1381_v46, %v1355_v60  ;;  %v351_v60 = vadd.f32 %v1145_v33, %v334_v56 }
  0xfe   :  { %v403_v55 = vmul.f32 %v402_v45, %v397_v48  ;;  %v409_v17 = vmul.f32 %v408_v49, %v397_v48  ;;  %v288_v48 = vmul.f32 %v286_v24, %v1454_v36 }
 0x100   :  { %v405_v53 = vadd.f32 %v403_v55, %v380_v50  ;;  %v290_v34 = vadd.f32 %v288_v48, %v262_v27 }
 0x104   :  { %v1399_v9 = vpop.permute.xlu1 %418  ;;  %v1483_v0 = vpop.permute.xlu2 %498 }
 0x105   :  { %v422_v14 = vsel %vm244_vm10, %v1399_v9, %v1395_v40 }
 0x106   :  { %v428_v16 = vmul.f32 %v427_v51, %v422_v14  ;;  %v434_v36 = vmul.f32 %v433_v21, %v422_v14  ;;  %v1619_v14 = vsel %vm220_vm6, %v398_v2, 0.0 }
 0x108   :  { %v430_v8 = vadd.f32 %v428_v16, %v405_v53  ;;  %v552_v53 = vstv %s1524_s25  ;;  %v1588_v16 = vsel %vm192_vm5, %v373_v52, 0.0  ;;  %s1851_s25 = sld [smem:[#allocation6 + $0x15]] }
 0x109   :  { %v379_v46 = vmul.f32 %v377_v42, %v1588_v16 }
 0x10c   :  { %v1411_v19 = vpop.permute.xlu0 %446  ;;  %v1443_v5 = vpop.permute.xlu1 %448 }
 0x10d   :  { %v451_v61 = vsel %vm82_vm0, %v1443_v5, %v1411_v19 }
 0x10e   :  { %v452_v43 = vsel %vm85_vm7, %v451_v61, 0.0  ;;  %v386_v61 = vadd.f32 %v384_v39, %v361_v37  ;;  %v577_v37 = vstv %s1541_s27  ;;  %s1889_s27 = sld [smem:[#allocation6 + $0x16]] }
 0x10f   :  { %v456_v58 = vmul.f32 %v455_v4, %v452_v43 }
 0x110   :  { %v411_v24 = vadd.f32 %v409_v17, %v386_v61  ;;  %v381_v17 = vadd.f32 %v379_v46, %v351_v60  ;;  %v558_v60 = vstv %s1615_s6  ;;  %s1964_s6 = sld [smem:[#allocation6 + $0xd]] }
 0x111   :  { %v458_v1 = vadd.f32 %v456_v58, %v430_v8  ;;  %v461_v58 = vstv %s1532_s26  ;;  %v423_v8 = vsel %vm244_vm10, %v1395_v40, %v1399_v9  ;;  %v313_v40 = vmul.f32 %v311_v15, %v1498_v28  ;;  %s1863_s26 = sld [smem:[#allocation6 + $0x8]] }
 0x112   :  { %v462_v47 = vmul.f32 %v461_v58, %v452_v43  ;;  %v511_v9 = vstv %s1559_s29  ;;  %v1635_v43 = vsel %vm248_vm11, %v423_v8, 0.0  ;;  %v404_v15 = vmul.f32 %v402_v45, %v1619_v14  ;;  %s1931_s29 = sld [smem:[#allocation6 + $0x19]] }
 0x113   :  { %v1646_v28 = vsel %vm82_vm0, %v1411_v19, %v1443_v5  ;;  %v429_v19 = vmul.f32 %v427_v51, %v1635_v43  ;;  %v614_v5 = vstv %s1600_s2  ;;  %v315_v48 = vadd.f32 %v313_v40, %v290_v34  ;;  %s1956_s2 = sld [smem:[#allocation6 + $0x1a]] }
 0x114   :  { %v1461_v11 = vpop.permute.xlu0 %473  ;;  %v583_v8 = vstv %s1630_s7  ;;  %s1968_s7 = sld [smem:[#allocation6 + $0x1b]] }
 0x115   :  { %v476_v18 = vsel %vm110_vm1, %v1461_v11, %v1427_v7 }
 0x116   :  { %v477_v26 = vsel %vm113_vm8, %v476_v18, 0.0 }
 0x117   :  { %v481_v29 = vmul.f32 %v480_v6, %v477_v26 }
 0x119   :  { %v483_v41 = vadd.f32 %v481_v29, %v458_v1  ;;  %v486_v29 = vstv %s1554_s28  ;;  %v602_v1 = vstv %s1570_s30  ;;  %s1893_s28 = sld [smem:[#allocation6 + $0xb]] }
 0x11a   :  { %s1954_s30 = sld [smem:[#allocation6 + $0xc]] }
 0x11c   :  { %v1492_v13 = vpop.permute.xlu1 %496 }
 0x11d   :  { %v501_v20 = vsel %vm138_vm2, %v1483_v0, %v1492_v13  ;;  %v500_v51 = vsel %vm138_vm2, %v1492_v13, %v1483_v0 }
 0x11e   :  { %v1539_v10 = vsel %vm141_vm9, %v501_v20, 0.0 }
 0x11f   :  { %v506_v50 = vmul.f32 %v505_v3, %v1539_v10  ;;  %v512_v56 = vmul.f32 %v511_v9, %v1539_v10  ;;  %v457_v10 = vmul.f32 %v455_v4, %v1646_v28 }
 0x121   :  { %v508_v20 = vadd.f32 %v506_v50, %v483_v41  ;;  %v487_v50 = vmul.f32 %v486_v29, %v477_v26 }
 0x123   :  { %v525_v33 = vadd.f32 %v1202_v62, %v508_v20  ;;  %v436_v62 = vadd.f32 %v434_v36, %v411_v24  ;;  %v338_v20 = vmul.f32 %v336_v44, %v1530_v12  ;;  %v406_v36 = vadd.f32 %v404_v15, %v381_v17 }
 0x124   :  { %v1548_v30 = vpop.permute.xlu2 %568  ;;  %v620_v15 = vstv %s1686_s8  ;;  %s2022_s8 = sld [smem:[#allocation7 + $0x1]] }
 0x125   :  { %v464_v26 = vadd.f32 %v462_v47, %v436_v62  ;;  %v431_v46 = vadd.f32 %v429_v19, %v406_v36 }
 0x127   :  { %v489_v2 = vadd.f32 %v487_v50, %v464_v26  ;;  %v459_v34 = vadd.f32 %v457_v10, %v431_v46 }
 0x129   :  { %v514_v44 = vadd.f32 %v512_v56, %v489_v2 }
 0x12b   :  { %v536_v0 = vadd.f32 %v1246_v22, %v514_v44 }
 0x12c   :  { %v596_v32 = vpop.permute.xlu2 %595 }
 0x134   :  { %v1515_v59 = vpop.permute.xlu0 %543  ;;  %v1564_v55 = vpop.permute.xlu1 %545 }
 0x135   :  { %v547_v38 = vsel %vm188_vm3, %v1515_v59, %v1564_v55  ;;  %v548_v13 = vsel %vm188_vm3, %v1564_v55, %v1515_v59 }
 0x136   :  { %v553_v39 = vmul.f32 %v552_v53, %v547_v38  ;;  %v550_v40 = vsel %vm192_vm5, %v548_v13, 0.0 }
 0x138   :  { %v555_v52 = vadd.f32 %v553_v39, %v525_v33  ;;  %v475_v39 = vsel %vm110_vm1, %v1427_v7, %v1461_v11  ;;  %v559_v33 = vmul.f32 %v558_v60, %v547_v38  ;;  %v507_v7 = vmul.f32 %v505_v3, %v500_v51 }
 0x139   :  { %v482_v47 = vmul.f32 %v480_v6, %v475_v39  ;;  %v608_v11 = vstv %s1648_s1  ;;  %s2016_s1 = sld [smem:[#allocation7]] }
 0x13a   :  { %v561_v22 = vadd.f32 %v559_v33, %v536_v0 }
 0x13b   :  { %v484_v3 = vadd.f32 %v482_v47, %v459_v34 }
 0x13c   :  { %v1574_v18 = vpop.permute.xlu0 %570 }
 0x13d   :  { %v572_v54 = vsel %vm216_vm4, %v1548_v30, %v1574_v18  ;;  %v573_v59 = vsel %vm216_vm4, %v1574_v18, %v1548_v30  ;;  %v509_v62 = vadd.f32 %v507_v7, %v484_v3  ;;  %v554_v18 = vmul.f32 %v552_v53, %v550_v40 }
 0x13e   :  { %v578_v42 = vmul.f32 %v577_v37, %v572_v54  ;;  %v584_v6 = vmul.f32 %v583_v8, %v572_v54  ;;  %v385_v54 = vmul.f32 %v383_v31, %v1588_v16  ;;  %v575_v30 = vsel %vm220_vm6, %v573_v59, 0.0 }
 0x13f   :  { %v410_v16 = vmul.f32 %v408_v49, %v1619_v14  ;;  %v435_v53 = vmul.f32 %v433_v21, %v1635_v43  ;;  %v585_v2 = vmul.f32 %v583_v8, %v575_v30 }
 0x140   :  { %v580_v27 = vadd.f32 %v578_v42, %v555_v52  ;;  %v340_v42 = vadd.f32 %v338_v20, %v315_v48  ;;  %v586_v50 = vadd.f32 %v584_v6, %v561_v22  ;;  %v513_v20 = vmul.f32 %v511_v9, %v500_v51 }
 0x142   :  { %v362_v38 = vadd.f32 %v1149_v35, %v340_v42 }
 0x144   :  { %v594_v61 = vpop.permute.xlu1 %593  ;;  %v387_v17 = vadd.f32 %v385_v54, %v362_v38 }
 0x145   :  { %v597_v41 = vsel %vm244_vm10, %v594_v61, %v596_v32  ;;  %v598_v52 = vsel %vm244_vm10, %v596_v32, %v594_v61  ;;  %v579_v32 = vmul.f32 %v577_v37, %v575_v30  ;;  %v463_v37 = vmul.f32 %v461_v58, %v1646_v28 }
 0x146   :  { %v603_v45 = vmul.f32 %v602_v1, %v597_v41  ;;  %v609_v55 = vmul.f32 %v608_v11, %v597_v41  ;;  %v600_v31 = vsel %vm248_vm11, %v598_v52, 0.0  ;;  %v526_v41 = vadd.f32 %v1204_v63, %v509_v62 }
 0x147   :  { %v604_v49 = vmul.f32 %v602_v1, %v600_v31  ;;  %v412_v14 = vadd.f32 %v410_v16, %v387_v17  ;;  %v746_v30 = vstv %s1801_s4  ;;  %v806_v16 = vstv %s1805_s14 }
 0x148   :  { %v605_v24 = vadd.f32 %v603_v45, %v580_v27  ;;  %v611_v35 = vadd.f32 %v609_v55, %v586_v50  ;;  %v556_v61 = vadd.f32 %v554_v18, %v526_v41  ;;  %v488_v27 = vmul.f32 %v486_v29, %v475_v39 }
 0x149   :  { %v437_v56 = vadd.f32 %v435_v53, %v412_v14  ;;  %v560_v29 = vmul.f32 %v558_v60, %v550_v40  ;;  %v634_v53 = vstv %s1809_s17  ;;  %v660_v14 = vstv %s1819_s20 }
 0x14a   :  { %v615_v12 = vadd.f32 %v614_v5, %v605_v24  ;;  %v621_v63 = vadd.f32 %v620_v15, %v611_v35  ;;  %v581_v26 = vadd.f32 %v579_v32, %v556_v61  ;;  %v610_v24 = vmul.f32 %v608_v11, %v600_v31 }
 0x14b   :  { %v465_v48 = vadd.f32 %v463_v37, %v437_v56  ;;  %v812_v32 = vstv %s1807_s15  ;;  %v706_v37 = vstv %s1821_s21 }
 0x14c   :  { %v1681_v4 = vmax.f32 %v615_v12, 0.0  ;;  %v606_v45 = vadd.f32 %v604_v49, %v581_v26  ;;  %v1740_v19 = vmax.f32 %v621_v63, 0.0  ;;  %v640_v49 = vstv %s1813_s18 }
 0x14d   :  { %v490_v21 = vadd.f32 %v488_v27, %v465_v48  ;;  %v654_v63 = vstv %s1817_s19 }
 0x14e   :  { %665 = vrot.lane.b32.xlu1 %v1681_v4, %s1065_s11  ;;  %645 = vrot.lane.b32.xlu2 %v1681_v4, %s1064_s9  ;;  %v616_v58 = vadd.f32 %v614_v5, %v606_v45  ;;  %v712_v45 = vstv %s1824_s0 }
 0x14f   :  { %625 = vrot.lane.b32.xlu0 %v1681_v4, %s1063_s3  ;;  %v515_v1 = vadd.f32 %v513_v20, %v490_v21 }
 0x150   :  { %v1752_v43 = vmax.f32 %v616_v58, 0.0 }
 0x151   :  { %v537_v28 = vadd.f32 %v1248_v23, %v515_v1 }
 0x153   :  { %v562_v9 = vadd.f32 %v560_v29, %v537_v28  ;;  %v726_v29 = vstv %s1827_s22  ;;  %v766_v28 = vstv %s1841_s24 }
 0x155   :  { %v587_v36 = vadd.f32 %v585_v2, %v562_v9 }
 0x156   :  { %737 = vrot.lane.b32.xlu1 %v1681_v4, %s1068_s16  ;;  %717 = vrot.lane.b32.xlu2 %v1681_v4, %s1067_s13 }
 0x157   :  { %697 = vrot.lane.b32.xlu0 %v1681_v4, %s1066_s12  ;;  %v612_v5 = vadd.f32 %v610_v24, %v587_v36 }
 0x159   :  { %v622_v23 = vadd.f32 %v620_v15, %v612_v5  ;;  %v752_v15 = vstv %s1803_s10  ;;  %v772_v5 = vstv %s1851_s25 }
 0x15b   :  { %v624_v10 = vmax.f32 %v622_v23, 0.0 }
 0x15e   :  { %797 = vrot.lane.b32.xlu1 %v1740_v19, %s1065_s11  ;;  %777 = vrot.lane.b32.xlu2 %v1740_v19, %s1064_s9 }
 0x15f   :  { %757 = vrot.lane.b32.xlu0 %v1740_v19, %s1063_s3 }
 0x166   :  { %849 = vrot.lane.b32.xlu2 %v1740_v19, %s1067_s13  ;;  %627 = vrot.lane.b32.xlu1 %v1752_v43, %s1063_s3 }
 0x167   :  { %829 = vrot.lane.b32.xlu0 %v1740_v19, %s1066_s12 }
 0x16e   :  { %667 = vrot.lane.b32.xlu2 %v1752_v43, %s1065_s11  ;;  %699 = vrot.lane.b32.xlu1 %v1752_v43, %s1066_s12 }
 0x16f   :  { %647 = vrot.lane.b32.xlu0 %v1752_v43, %s1064_s9 }
 0x176   :  { %739 = vrot.lane.b32.xlu2 %v1752_v43, %s1068_s16  ;;  %759 = vrot.lane.b32.xlu1 %v624_v10, %s1063_s3  ;;  %s971_s3 = sld [smem:[#allocation6 + $0x3]] }
 0x177   :  { %719 = vrot.lane.b32.xlu0 %v1752_v43, %s1067_s13 }
 0x17c   :  { %v686_v11 = vstv %s971_s3 }
 0x17d   :  { %v1833_v3 = vmul.f32 %v686_v11, %v1681_v4  ;;  %v1839_v59 = vmul.f32 %v686_v11, %v1752_v43 }
 0x17e   :  { %799 = vrot.lane.b32.xlu2 %v624_v10, %s1065_s11  ;;  %831 = vrot.lane.b32.xlu1 %v624_v10, %s1066_s12  ;;  %s1791_s11 = sld [smem:[#allocation6 + $0xa]] }
 0x17f   :  { %779 = vrot.lane.b32.xlu0 %v624_v10, %s1064_s9  ;;  %s1789_s9 = sld [smem:[#allocation6 + $0x11]] }
 0x180   :  { %s1793_s12 = sld [smem:[#allocation6 + $0x18]] }
 0x184   :  { %v818_v13 = vstv %s1791_s11 }
 0x185   :  { %v692_v0 = vstv %s1789_s9  ;;  %v1844_v55 = vmul.f32 %v818_v13, %v1740_v19 }
 0x186   :  { %871 = vrot.lane.b32.xlu2 %v624_v10, %s1068_s16  ;;  %869 = vrot.lane.b32.xlu1 %v1740_v19, %s1068_s16  ;;  %s1799_s16 = sld [smem:[#allocation6 + $0x10]]  ;;  %v824_v6 = vstv %s1793_s12  ;;  %v1836_v22 = vmul.f32 %v692_v0, %v1681_v4  ;;  %v1849_v40 = vmul.f32 %v692_v0, %v1752_v43  ;;  %v1853_v4 = vmul.f32 %v818_v13, %v624_v10 }
 0x187   :  { %851 = vrot.lane.b32.xlu0 %v624_v10, %s1067_s13  ;;  %s1797_s13 = sld [smem:[#allocation6 + $0x2]]  ;;  %v1856_v62 = vmul.f32 %v824_v6, %v1740_v19  ;;  %v1865_v35 = vmul.f32 %v824_v6, %v624_v10  ;;  %v732_v43 = vstv %s1830_s23 }
 0x18c   :  { %v680_v52 = vstv %s1799_s16 }
 0x18d   :  { %v674_v50 = vstv %s1797_s13 }
 0x1a8   :  { %v1779_v39 = vpop.permute.xlu2 %645 }
 0x1b0   :  { %v1781_v60 = vpop.permute.xlu2 %717 }
 0x1b8   :  { %v1783_v51 = vpop.permute.xlu2 %777 }
 0x1c0   :  { %v666_v44 = vpop.permute.xlu1 %665  ;;  %v1785_v12 = vpop.permute.xlu2 %849 }
 0x1c1   :  { %v1787_v46 = vpop.permute.xlu0 %625 }
 0x1c8   :  { %v738_v8 = vpop.permute.xlu1 %737  ;;  %v668_v33 = vpop.permute.xlu2 %667 }
 0x1c9   :  { %v1795_v47 = vpop.permute.xlu0 %697  ;;  %v670_v38 = vsel %vm138_vm2, %v668_v33, %v666_v44  ;;  %v669_v17 = vsel %vm138_vm2, %v666_v44, %v668_v33 }
 0x1ca   :  { %v671_v41 = vsel %vm141_vm9, %v670_v38, 0.0  ;;  %v676_v26 = vmul.f32 %v674_v50, %v669_v17  ;;  %v682_v20 = vmul.f32 %v680_v52, %v669_v17 }
 0x1cb   :  { %v675_v19 = vmul.f32 %v674_v50, %v671_v41  ;;  %v681_v48 = vmul.f32 %v680_v52, %v671_v41  ;;  %v792_v41 = vstv %s1889_s27 }
 0x1d0   :  { %v1811_v42 = vpop.permute.xlu1 %797  ;;  %v740_v7 = vpop.permute.xlu2 %739 }
 0x1d1   :  { %v1815_v34 = vpop.permute.xlu0 %757  ;;  %v742_v31 = vsel %vm244_vm10, %v740_v7, %v738_v8  ;;  %v741_v56 = vsel %vm244_vm10, %v738_v8, %v740_v7 }
 0x1d2   :  { %v744_v27 = vsel %vm248_vm11, %v742_v31, 0.0  ;;  %v1901_v2 = vmul.f32 %v746_v30, %v741_v56  ;;  %v1905_v24 = vmul.f32 %v752_v15, %v741_v56 }
 0x1d3   :  { %v1903_v9 = vmul.f32 %v746_v30, %v744_v27  ;;  %v1908_v23 = vmul.f32 %v752_v15, %v744_v27 }
 0x1d8   :  { %v628_v54 = vpop.permute.xlu1 %627  ;;  %v800_v21 = vpop.permute.xlu2 %799 }
 0x1d9   :  { %v1861_v18 = vpop.permute.xlu0 %829  ;;  %v630_v61 = vsel %vm82_vm0, %v628_v54, %v1787_v46  ;;  %v629_v1 = vsel %vm82_vm0, %v1787_v46, %v628_v54  ;;  %v802_v10 = vsel %vm138_vm2, %v800_v21, %v1811_v42  ;;  %v786_v46 = vstv %s1863_s26 }
 0x1da   :  { %v631_v58 = vsel %vm85_vm7, %v630_v61, 0.0  ;;  %v636_v33 = vmul.f32 %v634_v53, %v629_v1  ;;  %v642_v13 = vmul.f32 %v640_v49, %v629_v1 }
 0x1db   :  { %v635_v44 = vmul.f32 %v634_v53, %v631_v58  ;;  %v641_v50 = vmul.f32 %v640_v49, %v631_v58  ;;  %v801_v53 = vsel %vm138_vm2, %v1811_v42, %v800_v21 }
 0x1e0   :  { %v700_v36 = vpop.permute.xlu1 %699 }
 0x1e1   :  { %v648_v8 = vpop.permute.xlu0 %647  ;;  %v702_v0 = vsel %vm188_vm3, %v700_v36, %v1795_v47  ;;  %v701_v17 = vsel %vm188_vm3, %v1795_v47, %v700_v36 }
 0x1e2   :  { %v649_v7 = vsel %vm110_vm1, %v1779_v39, %v648_v8  ;;  %v650_v11 = vsel %vm110_vm1, %v648_v8, %v1779_v39  ;;  %v704_v31 = vsel %vm192_vm5, %v702_v0, 0.0  ;;  %v707_v27 = vmul.f32 %v706_v37, %v701_v17 }
 0x1e3   :  { %v651_v6 = vsel %vm113_vm8, %v650_v11, 0.0  ;;  %v656_v38 = vmul.f32 %v654_v63, %v649_v7  ;;  %v662_v54 = vmul.f32 %v660_v14, %v649_v7  ;;  %v708_v36 = vmul.f32 %v706_v37, %v704_v31 }
 0x1e4   :  { %v655_v52 = vmul.f32 %v654_v63, %v651_v6  ;;  %v661_v30 = vmul.f32 %v660_v14, %v651_v6  ;;  %v838_v63 = vstv %s1893_s28  ;;  %v803_v14 = vsel %vm141_vm9, %v802_v10, 0.0 }
 0x1e5   :  { %v658_v15 = vadd.f32 %v656_v38, %v636_v33  ;;  %v664_v39 = vadd.f32 %v662_v54, %v642_v13  ;;  %v713_v8 = vmul.f32 %v712_v45, %v701_v17  ;;  %v714_v0 = vmul.f32 %v712_v45, %v704_v31 }
 0x1e6   :  { %v657_v61 = vadd.f32 %v655_v52, %v635_v44  ;;  %v663_v49 = vadd.f32 %v661_v30, %v641_v50  ;;  %v808_v13 = vmul.f32 %v806_v16, %v801_v53  ;;  %v844_v38 = vstv %s1931_s29 }
 0x1e7   :  { %v678_v56 = vadd.f32 %v676_v26, %v658_v15  ;;  %v684_v47 = vadd.f32 %v682_v20, %v664_v39  ;;  %v813_v30 = vmul.f32 %v812_v32, %v803_v14 }
 0x1e8   :  { %v677_v58 = vadd.f32 %v675_v19, %v657_v61  ;;  %v683_v1 = vadd.f32 %v681_v48, %v663_v49  ;;  %v760_v33 = vpop.permute.xlu1 %759 }
 0x1e9   :  { %v690_v7 = vadd.f32 %v1839_v59, %v678_v56  ;;  %v696_v11 = vadd.f32 %v1849_v40, %v684_v47  ;;  %v720_v42 = vpop.permute.xlu0 %719  ;;  %v762_v21 = vsel %vm82_vm0, %v760_v33, %v1815_v34  ;;  %v761_v6 = vsel %vm82_vm0, %v1815_v34, %v760_v33 }
 0x1ea   :  { %v689_v26 = vadd.f32 %v1833_v3, %v677_v58  ;;  %v695_v20 = vadd.f32 %v1836_v22, %v683_v1  ;;  %v721_v37 = vsel %vm216_vm4, %v1781_v60, %v720_v42  ;;  %v722_v59 = vsel %vm216_vm4, %v720_v42, %v1781_v60 }
 0x1eb   :  { %v710_v40 = vadd.f32 %v708_v36, %v690_v7  ;;  %v716_v45 = vadd.f32 %v714_v0, %v696_v11  ;;  %v724_v19 = vsel %vm220_vm6, %v722_v59, 0.0  ;;  %v727_v48 = vmul.f32 %v726_v29, %v721_v37 }
 0x1ec   :  { %v709_v3 = vadd.f32 %v707_v27, %v689_v26  ;;  %v715_v22 = vadd.f32 %v713_v8, %v695_v20  ;;  %v728_v10 = vmul.f32 %v726_v29, %v724_v19  ;;  %v733_v44 = vmul.f32 %v732_v43, %v721_v37 }
 0x1ed   :  { %v734_v60 = vmul.f32 %v732_v43, %v724_v19  ;;  %v763_v29 = vsel %vm85_vm7, %v762_v21, 0.0  ;;  %v807_v43 = vmul.f32 %v806_v16, %v803_v14  ;;  %v814_v34 = vmul.f32 %v812_v32, %v801_v53 }
 0x1ee   :  { %v729_v54 = vadd.f32 %v727_v48, %v709_v3  ;;  %v730_v50 = vadd.f32 %v728_v10, %v710_v40  ;;  %v735_v52 = vadd.f32 %v733_v44, %v715_v22  ;;  %v768_v61 = vmul.f32 %v766_v28, %v761_v6  ;;  %v872_v48 = vpop.permute.xlu2 %871 }
 0x1ef   :  { %v736_v17 = vadd.f32 %v734_v60, %v716_v45  ;;  %v767_v16 = vmul.f32 %v766_v28, %v763_v29  ;;  %v774_v14 = vmul.f32 %v772_v5, %v761_v6  ;;  %v858_v11 = vstv %s1954_s30 }
 0x1f0   :  { %v749_v15 = vadd.f32 %v1901_v2, %v729_v54  ;;  %v755_v39 = vadd.f32 %v1905_v24, %v735_v52  ;;  %v750_v31 = vadd.f32 %v1903_v9, %v730_v50  ;;  %v832_v49 = vpop.permute.xlu1 %831  ;;  %v773_v9 = vmul.f32 %v772_v5, %v763_v29 }
 0x1f1   :  { %v756_v56 = vadd.f32 %v1908_v23, %v736_v17  ;;  %v780_v32 = vpop.permute.xlu0 %779  ;;  %v834_v2 = vsel %vm188_vm3, %v832_v49, %v1861_v18  ;;  %v833_v28 = vsel %vm188_vm3, %v1861_v18, %v832_v49  ;;  %v864_v0 = vstv %s1956_s2 }
 0x1f2   :  { %v770_v24 = vadd.f32 %v768_v61, %v750_v31  ;;  %v781_v23 = vsel %vm110_vm1, %v1783_v51, %v780_v32  ;;  %v782_v47 = vsel %vm110_vm1, %v780_v32, %v1783_v51  ;;  %v769_v58 = vadd.f32 %v767_v16, %v749_v15 }
 0x1f3   :  { %v776_v53 = vadd.f32 %v774_v14, %v756_v56  ;;  %v788_v27 = vmul.f32 %v786_v46, %v781_v23  ;;  %v794_v5 = vmul.f32 %v792_v41, %v781_v23  ;;  %v775_v1 = vadd.f32 %v773_v9, %v755_v39 }
 0x1f4   :  { %v783_v36 = vsel %vm113_vm8, %v782_v47, 0.0  ;;  %v836_v18 = vsel %vm192_vm5, %v834_v2, 0.0  ;;  %v878_v42 = vstv %s1964_s6  ;;  %v884_v21 = vstv %s1968_s7 }
 0x1f5   :  { %v787_v8 = vmul.f32 %v786_v46, %v783_v36  ;;  %v790_v33 = vadd.f32 %v788_v27, %v770_v24  ;;  %v793_v7 = vmul.f32 %v792_v41, %v783_v36  ;;  %v796_v51 = vadd.f32 %v794_v5, %v776_v53 }
 0x1f6   :  { %v839_v40 = vmul.f32 %v838_v63, %v833_v28  ;;  %v840_v45 = vmul.f32 %v838_v63, %v836_v18  ;;  %v845_v19 = vmul.f32 %v844_v38, %v833_v28  ;;  %v846_v46 = vmul.f32 %v844_v38, %v836_v18 }
 0x1f7   :  { %v789_v26 = vadd.f32 %v787_v8, %v769_v58  ;;  %v795_v20 = vadd.f32 %v793_v7, %v775_v1  ;;  %v810_v37 = vadd.f32 %v808_v13, %v790_v33  ;;  %v816_v59 = vadd.f32 %v814_v34, %v796_v51 }
 0x1f8   :  { %v870_v41 = vpop.permute.xlu1 %869  ;;  %v890_v16 = vstv %s2016_s1  ;;  %v903_v14 = vstv %s2022_s8 }
 0x1f9   :  { %v809_v3 = vadd.f32 %v807_v43, %v789_v26  ;;  %v815_v22 = vadd.f32 %v813_v30, %v795_v20  ;;  %v822_v10 = vadd.f32 %v1853_v4, %v810_v37  ;;  %v828_v44 = vadd.f32 %v1865_v35, %v816_v59  ;;  %v852_v13 = vpop.permute.xlu0 %851 }
 0x1fa   :  { %v853_v60 = vsel %vm216_vm4, %v1785_v12, %v852_v13  ;;  %v854_v63 = vsel %vm216_vm4, %v852_v13, %v1785_v12  ;;  %v873_v6 = vsel %vm244_vm10, %v870_v41, %v872_v48  ;;  %v874_v38 = vsel %vm244_vm10, %v872_v48, %v870_v41 }
 0x1fb   :  { %v821_v54 = vadd.f32 %v1844_v55, %v809_v3  ;;  %v827_v4 = vadd.f32 %v1856_v62, %v815_v22  ;;  %v842_v35 = vadd.f32 %v840_v45, %v822_v10  ;;  %v848_v50 = vadd.f32 %v846_v46, %v828_v44 }
 0x1fc   :  { %v856_v52 = vsel %vm220_vm6, %v854_v63, 0.0  ;;  %v859_v29 = vmul.f32 %v858_v11, %v853_v60  ;;  %v865_v43 = vmul.f32 %v864_v0, %v853_v60  ;;  %v876_v12 = vsel %vm248_vm11, %v874_v38, 0.0 }
 0x1fd   :  { %v841_v30 = vadd.f32 %v839_v40, %v821_v54  ;;  %v847_v34 = vadd.f32 %v845_v19, %v827_v4  ;;  %v860_v57 = vmul.f32 %v858_v11, %v856_v52  ;;  %v866_v17 = vmul.f32 %v864_v0, %v856_v52 }
 0x1fe   :  { %v879_v15 = vmul.f32 %v878_v42, %v873_v6  ;;  %v880_v55 = vmul.f32 %v878_v42, %v876_v12  ;;  %v885_v39 = vmul.f32 %v884_v21, %v873_v6  ;;  %v886_v62 = vmul.f32 %v884_v21, %v876_v12 }
 0x1ff   :  { %v861_v31 = vadd.f32 %v859_v29, %v841_v30  ;;  %v862_v61 = vadd.f32 %v860_v57, %v842_v35  ;;  %v867_v49 = vadd.f32 %v865_v43, %v847_v34  ;;  %v868_v56 = vadd.f32 %v866_v17, %v848_v50 }
 0x201   :  { %v881_v32 = vadd.f32 %v879_v15, %v861_v31  ;;  %v882_v2 = vadd.f32 %v880_v55, %v862_v61  ;;  %v887_v24 = vadd.f32 %v885_v39, %v867_v49  ;;  %v888_v9 = vadd.f32 %v886_v62, %v868_v56 }
 0x203   :  { %v891_v25 = vadd.f32 %v890_v16, %v881_v32  ;;  %v892_v23 = vadd.f32 %v890_v16, %v882_v2  ;;  %v904_v28 = vadd.f32 %v903_v14, %v887_v24  ;;  %v905_v53 = vadd.f32 %v903_v14, %v888_v9 }
 0x205   :  { %v894_v47 = vmax.f32 %v892_v23, 0.0  ;;  %v907_v27 = vmax.f32 %v905_v53, 0.0  ;;  %v893_v5 = vmax.f32 %v891_v25, 0.0  ;;  %v906_v1 = vmax.f32 %v904_v28, 0.0 }
 0x207   :  { %v897_v58 = vrot.slane %v894_v47, 4  ;;  %v910_v36 = vrot.slane %v907_v27, 4 }
 0x209   :  { %v899_v18 = vsel %vm898_vm12, %v893_v5, %v897_v58  ;;  %v911_v8 = vsel %vm898_vm12, %v906_v1, %v910_v36 }
 0x20a   :  { %901 = vst [vmem:[%s2055_s5] sm:$0xff] %v899_v18 }
 0x20b   :  { %994 = vst [vmem:[%s2055_s5 + $0x8] sm:$0xff] %v911_v8 }
 0x20c   :  { %919 = vsyncpa [#allocation3], 1 }
 0x20d   :  { %920 = vsyncpa [#allocation5], 1 }
 0x20e   :  { %921 = vsyncpa [#allocation8], 1 }

// kernel: gnn_layer_gcn_forward.3
= control target key start
LH: loop header
LB: loop body
LE: loop exit
PB: predicated region body
PF: predicated region fallthrough
CT: control target
= control target key end

     0   :  { %s713_s15 = smov 0   ;;  %s715_s16 = smov 0   ;;  %s833_s0 = inlined_call_operand.vmem [shape: f32[2,4,256], index: 0, kind: input, shape index: {}]   ;;  %s834_s1 = inlined_call_operand.vmem [shape: f32[2,256,256], index: 1, kind: input, shape index: {}]   ;;  %s835_s2 = inlined_call_operand.vmem [shape: f32[4,4], index: 2, kind: input, shape index: {}]   ;;  %s836_s3 = inlined_call_operand.vmem [shape: f32[2,1,256], index: 3, kind: input, shape index: {}]   ;;  %s837_s4 = inlined_call_operand.vmem [shape: f32[2,4,256], index: 4, kind: output, shape index: {}]  }
   0x1   :  { %s717_s17 = smov 0  }
   0x2 LB: > { %s26_s18 = sadd.s32 1, %s682_s16  ;;  %p623_p0 = scmp.ge.s32.totalorder %s686_s17, 1  ;;  %s686_s17 = sphi %s717_s17, %s14_s17   ;;  %s682_s16 = sphi %s715_s16, %s839_s16   ;;  %s678_s15 = sphi %s713_s15, %s838_s15  }
   0x3   : > { %p28_p1 = scmp.ge.s32.totalorder %s26_s18, 2  ;;  %p209_p2 = scmp.lt.s32.totalorder %s686_s17, 3 }
   0x5   : > { %s841_s18 = smov (%p28_p1, %s26_s18), 0  ;;  %p210_p3 = pnand %p623_p0, %p209_p2 }
   0x6   : > { %p256_p4 = scmp.lt.s32.totalorder (!%p210_p3), %s678_s15, 1 }
   0x7   : > { %213 = sbr.rel (%p210_p3) target bundleno = 315 (0x13b), region = 36 }
   0xc   : > { %s843_s15 = smov (!%p256_p4, %s678_s15), 1  ;;  %vm452_vm0 = vcmask 1043456   ;;  %vm448_vm1 = vcmask 31744  }
   0xd   : > { %s638_s19 = sshll.u32 %s843_s15, 9  ;;  %s637_s23 = sshll.u32 %s843_s15, 3 }
   0xe   : > { %s737_s22 = scalar_lea.vmem %s834_s1, %s638_s19  ;;  %s260_s26 = scalar_lea.vmem %s833_s0, %s637_s23 }
   0xf   : > { %v322_v0 = vld [vmem:[%s737_s22 + $0xf8] sm:$0xff]  ;;  %v320_v2 = vld [vmem:[%s737_s22 + $0xe8] sm:$0xff]  ;;  %v321_v6 = vld [vmem:[%s737_s22 + $0xf0] sm:$0xff]  ;;  %s628_s29 = sshll.u32 %s843_s15, 1  ;;  %s288_s9 = scalar_lea.vmem %s837_s4, %s637_s23 }
  0x10   : > { %v354_v1 = vld [vmem:[%s737_s22 + $0x1f8] sm:$0xff]  ;;  %401 = vmatpush.msra.mxu2 %v322_v0  ;;  %v352_v3 = vld [vmem:[%s737_s22 + $0x1e8] sm:$0xff]  ;;  %v353_v8 = vld [vmem:[%s737_s22 + $0x1f0] sm:$0xff]  ;;  %361 = vmatpush.msra.mxu0 %v321_v6  ;;  %s278_s6 = scalar_lea.vmem %s836_s3, %s628_s29 }
  0x11   : > { %421 = vmatpush.msra.mxu3 %v354_v1  ;;  %v318_v4 = vld [vmem:[%s737_s22 + $0xd8] sm:$0xff]  ;;  %v316_v7 = vld [vmem:[%s737_s22 + $0xc8] sm:$0xff]  ;;  %381 = vmatpush.msra.mxu1 %v353_v8  ;;  %v319_v10 = vld [vmem:[%s737_s22 + $0xe0] sm:$0xff] }
  0x12   : > { %v350_v5 = vld [vmem:[%s737_s22 + $0x1d8] sm:$0xff]  ;;  %402 = vmatpush.msra.mxu2 %v320_v2  ;;  %v348_v9 = vld [vmem:[%s737_s22 + $0x1c8] sm:$0xff]  ;;  %v351_v11 = vld [vmem:[%s737_s22 + $0x1e0] sm:$0xff]  ;;  %362 = vmatpush.msra.mxu0 %v319_v10 }
  0x13   : > { %422 = vmatpush.msra.mxu3 %v352_v3  ;;  %v317_v12 = vld [vmem:[%s737_s22 + $0xd0] sm:$0xff]  ;;  %v314_v14 = vld [vmem:[%s737_s22 + $0xb8] sm:$0xff]  ;;  %382 = vmatpush.msra.mxu1 %v351_v11  ;;  %v315_v16 = vld [vmem:[%s737_s22 + $0xc0] sm:$0xff] }
  0x14   : > { %403 = vmatpush.msra.mxu2 %v318_v4  ;;  %v349_v13 = vld [vmem:[%s737_s22 + $0x1d0] sm:$0xff]  ;;  %v346_v15 = vld [vmem:[%s737_s22 + $0x1b8] sm:$0xff]  ;;  %v347_v17 = vld [vmem:[%s737_s22 + $0x1c0] sm:$0xff]  ;;  %363 = vmatpush.msra.mxu0 %v317_v12 }
  0x15   : > { %423 = vmatpush.msra.mxu3 %v350_v5  ;;  %v312_v18 = vld [vmem:[%s737_s22 + $0xa8] sm:$0xff]  ;;  %383 = vmatpush.msra.mxu1 %v349_v13  ;;  %v313_v20 = vld [vmem:[%s737_s22 + $0xb0] sm:$0xff]  ;;  %v310_v22 = vld [vmem:[%s737_s22 + $0x98] sm:$0xff] }
  0x16   : > { %404 = vmatpush.msra.mxu2 %v316_v7  ;;  %v344_v19 = vld [vmem:[%s737_s22 + $0x1a8] sm:$0xff]  ;;  %v345_v21 = vld [vmem:[%s737_s22 + $0x1b0] sm:$0xff]  ;;  %v342_v23 = vld [vmem:[%s737_s22 + $0x198] sm:$0xff]  ;;  %364 = vmatpush.msra.mxu0 %v315_v16 }
  0x17   : > { %424 = vmatpush.msra.mxu3 %v348_v9  ;;  %384 = vmatpush.msra.mxu1 %v347_v17  ;;  %v311_v24 = vld [vmem:[%s737_s22 + $0xa0] sm:$0xff]  ;;  %v308_v26 = vld [vmem:[%s737_s22 + $0x88] sm:$0xff]  ;;  %v309_v28 = vld [vmem:[%s737_s22 + $0x90] sm:$0xff] }
  0x18   : > { %405 = vmatpush.msra.mxu2 %v314_v14  ;;  %v343_v25 = vld [vmem:[%s737_s22 + $0x1a0] sm:$0xff]  ;;  %v340_v27 = vld [vmem:[%s737_s22 + $0x188] sm:$0xff]  ;;  %365 = vmatpush.msra.mxu0 %v313_v20  ;;  %v341_v29 = vld [vmem:[%s737_s22 + $0x190] sm:$0xff] }
  0x19   : > { %425 = vmatpush.msra.mxu3 %v346_v15  ;;  %385 = vmatpush.msra.mxu1 %v345_v21  ;;  %v306_v30 = vld [vmem:[%s737_s22 + $0x78] sm:$0xff]  ;;  %v307_v32 = vld [vmem:[%s737_s22 + $0x80] sm:$0xff]  ;;  %v304_v34 = vld [vmem:[%s737_s22 + $0x68] sm:$0xff] }
  0x1a   : > { %406 = vmatpush.msra.mxu2 %v312_v18  ;;  %v338_v31 = vld [vmem:[%s737_s22 + $0x178] sm:$0xff]  ;;  %366 = vmatpush.msra.mxu0 %v311_v24  ;;  %v339_v33 = vld [vmem:[%s737_s22 + $0x180] sm:$0xff]  ;;  %v336_v35 = vld [vmem:[%s737_s22 + $0x168] sm:$0xff] }
  0x1b   : > { %426 = vmatpush.msra.mxu3 %v344_v19  ;;  %386 = vmatpush.msra.mxu1 %v343_v25  ;;  %v305_v36 = vld [vmem:[%s737_s22 + $0x70] sm:$0xff]  ;;  %v302_v38 = vld [vmem:[%s737_s22 + $0x58] sm:$0xff]  ;;  %v290_v40 = vld [vmem:[%s260_s26] sm:$0xff] }
  0x1c   : > { %407 = vmatpush.msra.mxu2 %v310_v22  ;;  %367 = vmatpush.msra.mxu0 %v309_v28  ;;  %v337_v37 = vld [vmem:[%s737_s22 + $0x170] sm:$0xff]  ;;  %v334_v39 = vld [vmem:[%s737_s22 + $0x158] sm:$0xff]  ;;  %v303_v41 = vld [vmem:[%s737_s22 + $0x60] sm:$0xff]  ;;  %356 = vst [vmem:[#allocation1] ss:$2 sm:$0xff] %v290_v40 }
  0x1d   : > { %427 = vmatpush.msra.mxu3 %v342_v23  ;;  %387 = vmatpush.msra.mxu1 %v341_v29  ;;  %v335_v42 = vld [vmem:[%s737_s22 + $0x160] sm:$0xff]  ;;  %v300_v43 = vld [vmem:[%s737_s22 + $0x48] sm:$0xff]  ;;  %v301_v45 = vld [vmem:[%s737_s22 + $0x50] sm:$0xff] }
  0x1e   : > { %408 = vmatpush.msra.mxu2 %v308_v26  ;;  %368 = vmatpush.msra.mxu0 %v307_v32  ;;  %v332_v44 = vld [vmem:[%s737_s22 + $0x148] sm:$0xff]  ;;  %v333_v46 = vld [vmem:[%s737_s22 + $0x150] sm:$0xff]  ;;  %v298_v47 = vld [vmem:[%s737_s22 + $0x38] sm:$0xff] }
  0x1f   : > { %428 = vmatpush.msra.mxu3 %v340_v27  ;;  %388 = vmatpush.msra.mxu1 %v339_v33  ;;  %v330_v48 = vld [vmem:[%s737_s22 + $0x138] sm:$0xff]  ;;  %v299_v49 = vld [vmem:[%s737_s22 + $0x40] sm:$0xff]  ;;  %v296_v51 = vld [vmem:[%s737_s22 + $0x28] sm:$0xff] }
  0x20   : > { %409 = vmatpush.msra.mxu2 %v306_v30  ;;  %369 = vmatpush.msra.mxu0 %v305_v36  ;;  %v331_v50 = vld [vmem:[%s737_s22 + $0x140] sm:$0xff]  ;;  %v328_v52 = vld [vmem:[%s737_s22 + $0x128] sm:$0xff]  ;;  %v297_v53 = vld [vmem:[%s737_s22 + $0x30] sm:$0xff] }
  0x21   : > { %429 = vmatpush.msra.mxu3 %v338_v31  ;;  %389 = vmatpush.msra.mxu1 %v337_v37  ;;  %v329_v54 = vld [vmem:[%s737_s22 + $0x130] sm:$0xff]  ;;  %v294_v55 = vld [vmem:[%s737_s22 + $0x18] sm:$0xff]  ;;  %v295_v57 = vld [vmem:[%s737_s22 + $0x20] sm:$0xff] }
  0x22   : > { %410 = vmatpush.msra.mxu2 %v304_v34  ;;  %370 = vmatpush.msra.mxu0 %v303_v41  ;;  %v326_v56 = vld [vmem:[%s737_s22 + $0x118] sm:$0xff]  ;;  %v327_v58 = vld [vmem:[%s737_s22 + $0x120] sm:$0xff]  ;;  %v292_v59 = vld [vmem:[%s737_s22 + $0x8] sm:$0xff] }
  0x23   : > { %430 = vmatpush.msra.mxu3 %v336_v35  ;;  %390 = vmatpush.msra.mxu1 %v335_v42  ;;  %v324_v60 = vld [vmem:[%s737_s22 + $0x108] sm:$0xff]  ;;  %v357_v61 = vld.sshfl [vmem:[#allocation1] sm:$0xff pattern:$0x75316420]  ;;  %v293_v63 = vld [vmem:[%s737_s22 + $0x10] sm:$0xff] }
  0x24   : > { %411 = vmatpush.msra.mxu2 %v302_v38  ;;  %371 = vmatpush.msra.mxu0 %v301_v45  ;;  %v358_v62 = vld.sshfl [vmem:[#allocation1 + $0x8] sm:$0xff pattern:$0x75316420]  ;;  %v325_v0 = vld [vmem:[%s737_s22 + $0x110] sm:$0xff]  ;;  %v291_v1 = vld [vmem:[%s737_s22] sm:$0xff] }
  0x25   : > { %431 = vmatpush.msra.mxu3 %v334_v39  ;;  %391 = vmatpush.msra.mxu1 %v333_v46  ;;  %v323_v2 = vld [vmem:[%s737_s22 + $0x100] sm:$0xff] }
  0x26   : > { %412 = vmatpush.msra.mxu2 %v300_v43  ;;  %372 = vmatpush.msra.mxu0 %v299_v49  ;;  %v441_v9 = vld [vmem:[%s835_s2] sm:$0xf] }
  0x27   : > { %432 = vmatpush.msra.mxu3 %v332_v44  ;;  %392 = vmatpush.msra.mxu1 %v331_v50  ;;  %v442_v10 = vld [vmem:[%s278_s6] sm:$0x3] }
  0x28   : > { %413 = vmatpush.msra.mxu2 %v298_v47  ;;  %373 = vmatpush.msra.mxu0 %v297_v53  ;;  %v445_v11 = vperm.slane %v442_v10, 1  ;;  %v444_v12 = vperm.slane %v442_v10, 0 }
  0x29   : > { %433 = vmatpush.msra.mxu3 %v330_v48  ;;  %393 = vmatpush.msra.mxu1 %v329_v54 }
  0x2a   : > { %414 = vmatpush.msra.mxu2 %v296_v51  ;;  %374 = vmatpush.msra.mxu0 %v295_v57 }
  0x2b   : > { %434 = vmatpush.msra.mxu3 %v328_v52  ;;  %394 = vmatpush.msra.mxu1 %v327_v58 }
  0x2c   : > { %415 = vmatpush.msra.mxu2 %v294_v55  ;;  %375 = vmatpush.msra.mxu0 %v293_v63 }
  0x2d   : > { %435 = vmatpush.msra.mxu3 %v326_v56  ;;  %395 = vmatpush.msra.mxu1 %v325_v0 }
  0x2e   : > { %416 = vmatpush.msra.mxu2 %v292_v59  ;;  %376 = vmatpush.msra.mxu0 %v291_v1 }
  0x2f   : > { %436 = vmatpush.msra.mxu3 %v324_v60  ;;  %417 = vmatmul.f32.vlgmr.msra.gmra.mxu2 %v357_v61 }
  0x30   : > { %437 = vmatmul.f32.vlgmr.msra.gmra.mxu3 %v358_v62  ;;  %396 = vmatpush.msra.mxu1 %v323_v2 }
  0x31   : > { %377 = vmatmul.f32.vlgmr.msra.gmra.mxu0 %v357_v61  ;;  %397 = vmatmul.f32.vlgmr.msra.gmra.mxu1 %v358_v62 }
  0xae   : > { %v378_v3 = vpop.f32.mrf.mxu0  ;;  %v398_v4 = vpop.f32.mrf.mxu1 }
  0xaf   : > { %v399_v5 = vadd.f32 %v398_v4, %v378_v3 }
  0xb1   : > { %631 = vmatpush.msk.msrb.mxu0 %vm452_vm0, %v399_v5 }
  0xb2   : > { %v418_v6 = vpop.f32.mrf.mxu2  ;;  %632 = vmatmul.msk.f32.vlgmr.msrb.gmra.mxu0 %vm448_vm1, %v441_v9 }
  0xb3   : > { %v438_v7 = vpop.f32.mrf.mxu3 }
  0xb4   : > { %v439_v8 = vadd.f32 %v438_v7, %v418_v6 }
  0xb6   : > { %633 = vmatpush.msk.msrb.mxu1 %vm452_vm0, %v439_v8 }
  0xb7   : > { %634 = vmatmul.msk.f32.vlgmr.msrb.gmra.mxu1 %vm448_vm1, %v441_v9 }
 0x12f   : > { %v476_v13 = vpop.f32.mrf.mxu0 }
 0x130   : > { %v477_v16 = vadd.f32 %v476_v13, %v444_v12 }
 0x134   : > { %v496_v14 = vpop.f32.mrf.mxu1 }
 0x135   : > { %v497_v15 = vadd.f32 %v496_v14, %v445_v11 }
 0x137   : > { %v501_v17 = vrot.slane %v497_v15, 4 }
 0x139   : > { %v502_v18 = vsel %vm452_vm0, %v477_v16, %v501_v17 }
 0x13a   : > { %504 = vst [vmem:[%s288_s9] sm:$0xff] %v502_v18 }
 0x13b PF: > { %s14_s17 = sadd.s32 1, %s686_s17   ;;  %s838_s15 = smov %s682_s16 }
 0x13c   : > { %p11_p5 = scmp.ge.s32.totalorder %s14_s17, 4   ;;  %s839_s16 = smov %s841_s18 }
 0x13e   :  { %13 = sbr.rel (!%p11_p5) target bundleno = 2 (0x2), region = 72 }

</bundles_post_ra>
